<compile_context>
chip_gen: v7x
topology: tpu7x:2x2x1
jax: 0.10.0
libtpu: 0.0.40
codegen_flags: <defaults>
</compile_context>

<pallas_src>
import functools
import math

import jax
import jax.numpy as jnp
from jax.experimental import pallas as pl
from jax.experimental.pallas import tpu as pltpu

# ----- small synthetic BERT config -----
VOCAB = 100
HIDDEN = 32
SEQ = 8
BATCH = 2
HEADS = 2
HEAD_DIM = HIDDEN // HEADS
INTER = 64
LAYERS = 2
MAX_POS = 16
LN_EPS = 1e-12
DROPOUT_P = 0.1  # BertTextProcessor.__init__ default


def _gelu(x):
    # tanh approximation of GELU (EUP-friendly)
    c = math.sqrt(2.0 / math.pi)
    return 0.5 * x * (1.0 + jnp.tanh(c * (x + 0.044715 * x * x * x)))


def _layernorm(x, g, b):
    mu = jnp.mean(x, axis=-1, keepdims=True)
    xc = x - mu
    var = jnp.mean(xc * xc, axis=-1, keepdims=True)
    return xc * jax.lax.rsqrt(var + LN_EPS) * g + b


# ---------------- the single fused kernel ----------------

def _bert_fused_kernel(
    emb_ref, mask_ref, u_ref,                       # activations / mask / dropout uniforms
    eg_ref, eb_ref,                                 # embedding LN gamma/beta
    wqkv_ref, bqkv_ref, wo_ref, bo_ref,             # per-layer attention weights (stacked on L)
    ln1g_ref, ln1b_ref,
    w1_ref, b1_ref, w2_ref, b2_ref,                 # per-layer FFN weights (stacked on L)
    ln2g_ref, ln2b_ref,
    pw_ref, pb_ref,                                 # pooler
    o_ref, *, p):
    f32 = jnp.float32

    # ---- embedding LayerNorm (no zero-residual input; pure LN) ----
    h = _layernorm(emb_ref[...], eg_ref[...], eb_ref[...])          # (B*S, H)

    # ---- attention mask bias computed in-kernel from the (B, S) mask ----
    bias = (1.0 - mask_ref[...]) * -1e9                             # (B, S)
    scale = 1.0 / math.sqrt(HEAD_DIM)

    # ---- encoder layers, fully unrolled; everything stays in VMEM ----
    for l in range(LAYERS):
        # fused QKV projection -> (B*S, 3*HIDDEN); single lane-denser matmul
        qkv = jnp.dot(h, wqkv_ref[l], preferred_element_type=f32) + bqkv_ref[l]

        # per-(batch, head) attention on 2-D tiles (no 4-D reshapes/transposes)
        ctx_rows = []
        for b in range(BATCH):
            r0 = b * SEQ
            bias_b = bias[b:b + 1, :]                               # (1, S)
            head_outs = []
            for hh in range(HEADS):
                c0 = hh * HEAD_DIM
                q = qkv[r0:r0 + SEQ, c0:c0 + HEAD_DIM]
                k = qkv[r0:r0 + SEQ, HIDDEN + c0:HIDDEN + c0 + HEAD_DIM]
                v = qkv[r0:r0 + SEQ, 2 * HIDDEN + c0:2 * HIDDEN + c0 + HEAD_DIM]
                s = jax.lax.dot_general(
                    q, k, (((1,), (1,)), ((), ())),
                    preferred_element_type=f32) * scale             # (S, S) = q @ k^T
                s = s + bias_b
                s = s - jnp.max(s, axis=-1, keepdims=True)
                e = jnp.exp(s)
                pattn = e / jnp.sum(e, axis=-1, keepdims=True)
                head_outs.append(
                    jnp.dot(pattn, v, preferred_element_type=f32))  # (S, Dh)
            ctx_rows.append(jnp.concatenate(head_outs, axis=-1))    # (S, H)
        ctx = jnp.concatenate(ctx_rows, axis=0)                     # (B*S, H)

        attn_out = jnp.dot(ctx, wo_ref[l], preferred_element_type=f32) + bo_ref[l]
        h1 = _layernorm(attn_out + h, ln1g_ref[l], ln1b_ref[l])

        ffn = _gelu(jnp.dot(h1, w1_ref[l], preferred_element_type=f32) + b1_ref[l])
        ffn = jnp.dot(ffn, w2_ref[l], preferred_element_type=f32) + b2_ref[l]
        h = _layernorm(ffn + h1, ln2g_ref[l], ln2b_ref[l])

    # ---- pooler on the [CLS] rows (row b*SEQ of the slab) + dropout ----
    cls = jnp.concatenate([h[b * SEQ:b * SEQ + 1, :] for b in range(BATCH)], axis=0)
    pooled = jnp.tanh(jnp.dot(cls, pw_ref[...], preferred_element_type=f32)
                      + pb_ref[...])                                # (B, H)

    # nn.Dropout(p), training mode, inverted dropout with precomputed uniforms
    keep = (u_ref[...] >= p).astype(f32)
    o_ref[...] = pooled * keep * (1.0 / (1.0 - p))


# ---------------- parameters (deterministic synthetic init) ----------------

def init_params(key):
    def nrm(k, shape):
        return 0.02 * jax.random.normal(k, shape, dtype=jnp.float32)

    keys = iter(jax.random.split(key, 32))
    wqkv, wo, w1, w2 = [], [], [], []
    for _ in range(LAYERS):
        wq = nrm(next(keys), (HIDDEN, HIDDEN))
        wk = nrm(next(keys), (HIDDEN, HIDDEN))
        wv = nrm(next(keys), (HIDDEN, HIDDEN))
        wqkv.append(jnp.concatenate([wq, wk, wv], axis=1))          # (H, 3H) fused QKV
        wo.append(nrm(next(keys), (HIDDEN, HIDDEN)))
        w1.append(nrm(next(keys), (HIDDEN, INTER)))
        w2.append(nrm(next(keys), (INTER, HIDDEN)))

    params = {
        "word_emb": nrm(next(keys), (VOCAB, HIDDEN)),
        "pos_emb": nrm(next(keys), (MAX_POS, HIDDEN)),
        "type_emb": nrm(next(keys), (2, HIDDEN)),
        "emb_ln_g": jnp.ones((1, HIDDEN), jnp.float32),
        "emb_ln_b": jnp.zeros((1, HIDDEN), jnp.float32),
        "wqkv": jnp.stack(wqkv),                                    # (L, H, 3H)
        "bqkv": jnp.zeros((LAYERS, 1, 3 * HIDDEN), jnp.float32),
        "wo": jnp.stack(wo),                                        # (L, H, H)
        "bo": jnp.zeros((LAYERS, 1, HIDDEN), jnp.float32),
        "ln1_g": jnp.ones((LAYERS, 1, HIDDEN), jnp.float32),
        "ln1_b": jnp.zeros((LAYERS, 1, HIDDEN), jnp.float32),
        "w1": jnp.stack(w1),                                        # (L, H, INTER)
        "b1": jnp.zeros((LAYERS, 1, INTER), jnp.float32),
        "w2": jnp.stack(w2),                                        # (L, INTER, H)
        "b2": jnp.zeros((LAYERS, 1, HIDDEN), jnp.float32),
        "ln2_g": jnp.ones((LAYERS, 1, HIDDEN), jnp.float32),
        "ln2_b": jnp.zeros((LAYERS, 1, HIDDEN), jnp.float32),
        "pool_w": nrm(next(keys), (HIDDEN, HIDDEN)),
        "pool_b": jnp.zeros((1, HIDDEN), jnp.float32),
    }
    return params


# ---------------- forward = BertTextProcessor.forward ----------------

@jax.jit
def bert_text_processor_forward(params, input_ids, attention_mask, dropout_key):
    b, s = input_ids.shape
    # Embedding gather is wrapper-side glue (no clean in-kernel gather at this size).
    emb = (jnp.take(params["word_emb"], input_ids, axis=0)
           + params["pos_emb"][:s][None, :, :]
           + params["type_emb"][0][None, None, :]).reshape(b * s, HIDDEN)

    mask_f = attention_mask.astype(jnp.float32)                     # (B, S)

    # TODO(synk): dropout RNG drawn wrapper-side with jax.random; in-kernel
    # pltpu.prng_seed/prng_random_bits does not lower under interpret mode.
    u = jax.random.uniform(dropout_key, (b, HIDDEN), dtype=jnp.float32)

    args = (emb, mask_f, u,
            params["emb_ln_g"], params["emb_ln_b"],
            params["wqkv"], params["bqkv"], params["wo"], params["bo"],
            params["ln1_g"], params["ln1_b"],
            params["w1"], params["b1"], params["w2"], params["b2"],
            params["ln2_g"], params["ln2_b"],
            params["pool_w"], params["pool_b"])

    return pl.pallas_call(
        functools.partial(_bert_fused_kernel, p=DROPOUT_P),
        in_specs=[pl.BlockSpec(memory_space=pltpu.MemorySpace.VMEM)] * len(args),
        out_specs=pl.BlockSpec(memory_space=pltpu.MemorySpace.VMEM),
        out_shape=jax.ShapeDtypeStruct((b, HIDDEN), jnp.float32),
    )(*args)


if __name__ == "__main__":
    key = jax.random.PRNGKey(0)
    pkey, ikey, dkey = jax.random.split(key, 3)
    params = init_params(pkey)

    input_ids = jax.random.randint(ikey, (BATCH, SEQ), 0, VOCAB, dtype=jnp.int32)
    attention_mask = jnp.array(
        [[1] * SEQ,
         [1] * (SEQ - 3) + [0] * 3], dtype=jnp.int32)

    out = bert_text_processor_forward(params, input_ids, attention_mask, dkey)
    out = jax.block_until_ready(out)
    assert out.shape == (BATCH, HIDDEN) and out.dtype == jnp.float32
    assert bool(jnp.all(jnp.isfinite(out)))
    print("KERNEL_OK")
</pallas_src>

<mosaic_0001>
module attributes {stable_mosaic.version = 11 : i64} {
  func.func @_bert_fused_kernel(%arg0: memref<16x32xf32, #tpu.memory_space<vmem>>, %arg1: memref<2x8xf32, #tpu.memory_space<vmem>>, %arg2: memref<2x32xf32, #tpu.memory_space<vmem>>, %arg3: memref<1x32xf32, #tpu.memory_space<vmem>>, %arg4: memref<1x32xf32, #tpu.memory_space<vmem>>, %arg5: memref<2x32x96xf32, #tpu.memory_space<vmem>>, %arg6: memref<2x1x96xf32, #tpu.memory_space<vmem>>, %arg7: memref<2x32x32xf32, #tpu.memory_space<vmem>>, %arg8: memref<2x1x32xf32, #tpu.memory_space<vmem>>, %arg9: memref<2x1x32xf32, #tpu.memory_space<vmem>>, %arg10: memref<2x1x32xf32, #tpu.memory_space<vmem>>, %arg11: memref<2x32x64xf32, #tpu.memory_space<vmem>>, %arg12: memref<2x1x64xf32, #tpu.memory_space<vmem>>, %arg13: memref<2x64x32xf32, #tpu.memory_space<vmem>>, %arg14: memref<2x1x32xf32, #tpu.memory_space<vmem>>, %arg15: memref<2x1x32xf32, #tpu.memory_space<vmem>>, %arg16: memref<2x1x32xf32, #tpu.memory_space<vmem>>, %arg17: memref<32x32xf32, #tpu.memory_space<vmem>>, %arg18: memref<1x32xf32, #tpu.memory_space<vmem>>, %arg19: memref<2x32xf32, #tpu.memory_space<vmem>>) attributes {dimension_semantics = [], scalar_prefetch = 0 : i64, scratch_operands = 0 : i64, tpu.core_type = #tpu.core_type<tc>} {
    %c0 = arith.constant 0 : index
    %c0_0 = arith.constant 0 : index
    %0 = vector.load %arg0[%c0, %c0_0] : memref<16x32xf32, #tpu.memory_space<vmem>>, vector<16x32xf32>
    %c0_1 = arith.constant 0 : index
    %c0_2 = arith.constant 0 : index
    %1 = vector.load %arg3[%c0_1, %c0_2] : memref<1x32xf32, #tpu.memory_space<vmem>>, vector<1x32xf32>
    %c0_3 = arith.constant 0 : index
    %c0_4 = arith.constant 0 : index
    %2 = vector.load %arg4[%c0_3, %c0_4] : memref<1x32xf32, #tpu.memory_space<vmem>>, vector<1x32xf32>
    %cst = arith.constant dense<0.000000e+00> : vector<16xf32>
    %3 = vector.multi_reduction <add>, %0, %cst [1] : vector<16x32xf32> to vector<16xf32>
    %4 = vector.shape_cast %3 : vector<16xf32> to vector<16x1xf32>
    %cst_5 = arith.constant 3.200000e+01 : f32
    %5 = vector.broadcast %cst_5 : f32 to vector<16x1xf32>
    %6 = arith.divf %4, %5 : vector<16x1xf32>
    %7 = vector.broadcast %6 : vector<16x1xf32> to vector<16x32xf32>
    %8 = arith.subf %0, %7 : vector<16x32xf32>
    %9 = arith.mulf %8, %8 : vector<16x32xf32>
    %cst_6 = arith.constant dense<0.000000e+00> : vector<16xf32>
    %10 = vector.multi_reduction <add>, %9, %cst_6 [1] : vector<16x32xf32> to vector<16xf32>
    %11 = vector.shape_cast %10 : vector<16xf32> to vector<16x1xf32>
    %cst_7 = arith.constant 3.200000e+01 : f32
    %12 = vector.broadcast %cst_7 : f32 to vector<16x1xf32>
    %13 = arith.divf %11, %12 : vector<16x1xf32>
    %cst_8 = arith.constant 9.99999996E-13 : f32
    %14 = vector.broadcast %cst_8 : f32 to vector<16x1xf32>
    %15 = arith.addf %13, %14 : vector<16x1xf32>
    %16 = math.rsqrt %15 : vector<16x1xf32>
    %17 = vector.broadcast %16 : vector<16x1xf32> to vector<16x32xf32>
    %18 = arith.mulf %8, %17 : vector<16x32xf32>
    %19 = vector.broadcast %1 : vector<1x32xf32> to vector<16x32xf32>
    %20 = arith.mulf %18, %19 : vector<16x32xf32>
    %21 = vector.broadcast %2 : vector<1x32xf32> to vector<16x32xf32>
    %22 = arith.addf %20, %21 : vector<16x32xf32>
    %c0_9 = arith.constant 0 : index
    %c0_10 = arith.constant 0 : index
    %23 = vector.load %arg1[%c0_9, %c0_10] : memref<2x8xf32, #tpu.memory_space<vmem>>, vector<2x8xf32>
    %cst_11 = arith.constant 1.000000e+00 : f32
    %24 = vector.broadcast %cst_11 : f32 to vector<2x8xf32>
    %25 = arith.subf %24, %23 : vector<2x8xf32>
    %cst_12 = arith.constant -1.000000e+09 : f32
    %26 = vector.broadcast %cst_12 : f32 to vector<2x8xf32>
    %27 = arith.mulf %25, %26 : vector<2x8xf32>
    %c0_13 = arith.constant 0 : index
    %c0_14 = arith.constant 0 : index
    %c0_15 = arith.constant 0 : index
    %28 = vector.load %arg5[%c0_13, %c0_14, %c0_15] : memref<2x32x96xf32, #tpu.memory_space<vmem>>, vector<1x32x96xf32>
    %29 = vector.shape_cast %28 : vector<1x32x96xf32> to vector<32x96xf32>
    %cst_16 = arith.constant dense<0.000000e+00> : vector<16x96xf32>
    %30 = tpu.matmul %22, %29, %cst_16 {dimension_numbers = #tpu.dot_dimension_numbers<[1], [0], [0], [1], [0, 0, 1, 1], [], []>} : vector<16x32xf32>, vector<32x96xf32>, vector<16x96xf32> -> vector<16x96xf32>
    %c0_17 = arith.constant 0 : index
    %c0_18 = arith.constant 0 : index
    %c0_19 = arith.constant 0 : index
    %31 = vector.load %arg6[%c0_17, %c0_18, %c0_19] : memref<2x1x96xf32, #tpu.memory_space<vmem>>, vector<1x1x96xf32>
    %32 = vector.shape_cast %31 : vector<1x1x96xf32> to vector<1x96xf32>
    %33 = vector.broadcast %32 : vector<1x96xf32> to vector<16x96xf32>
    %34 = arith.addf %30, %33 : vector<16x96xf32>
    %35 = vector.extract_strided_slice %27 {offsets = [0, 0], sizes = [1, 8], strides = [1, 1]} : vector<2x8xf32> to vector<1x8xf32>
    %36 = vector.extract_strided_slice %34 {offsets = [0, 0], sizes = [8, 16], strides = [1, 1]} : vector<16x96xf32> to vector<8x16xf32>
    %37 = vector.extract_strided_slice %34 {offsets = [0, 32], sizes = [8, 16], strides = [1, 1]} : vector<16x96xf32> to vector<8x16xf32>
    %38 = vector.extract_strided_slice %34 {offsets = [0, 64], sizes = [8, 16], strides = [1, 1]} : vector<16x96xf32> to vector<8x16xf32>
    %cst_20 = arith.constant dense<0.000000e+00> : vector<8x8xf32>
    %39 = tpu.matmul %36, %37, %cst_20 {dimension_numbers = #tpu.dot_dimension_numbers<[1], [1], [0], [0], [0, 0, 1, 0], [], []>} : vector<8x16xf32>, vector<8x16xf32>, vector<8x8xf32> -> vector<8x8xf32>
    %cst_21 = arith.constant 2.500000e-01 : f32
    %40 = vector.broadcast %cst_21 : f32 to vector<8x8xf32>
    %41 = arith.mulf %39, %40 : vector<8x8xf32>
    %42 = vector.broadcast %35 : vector<1x8xf32> to vector<8x8xf32>
    %43 = arith.addf %41, %42 : vector<8x8xf32>
    %cst_22 = arith.constant dense<0xFF800000> : vector<8xf32>
    %44 = vector.multi_reduction <maximumf>, %43, %cst_22 [1] : vector<8x8xf32> to vector<8xf32>
    %45 = vector.shape_cast %44 : vector<8xf32> to vector<8x1xf32>
    %46 = vector.broadcast %45 : vector<8x1xf32> to vector<8x8xf32>
    %47 = arith.subf %43, %46 : vector<8x8xf32>
    %48 = math.exp %47 : vector<8x8xf32>
    %cst_23 = arith.constant dense<0.000000e+00> : vector<8xf32>
    %49 = vector.multi_reduction <add>, %48, %cst_23 [1] : vector<8x8xf32> to vector<8xf32>
    %50 = vector.shape_cast %49 : vector<8xf32> to vector<8x1xf32>
    %51 = vector.broadcast %50 : vector<8x1xf32> to vector<8x8xf32>
    %52 = arith.divf %48, %51 : vector<8x8xf32>
    %cst_24 = arith.constant dense<0.000000e+00> : vector<8x16xf32>
    %53 = tpu.matmul %52, %38, %cst_24 {dimension_numbers = #tpu.dot_dimension_numbers<[1], [0], [0], [1], [0, 0, 1, 1], [], []>} : vector<8x8xf32>, vector<8x16xf32>, vector<8x16xf32> -> vector<8x16xf32>
    %54 = vector.extract_strided_slice %34 {offsets = [0, 16], sizes = [8, 16], strides = [1, 1]} : vector<16x96xf32> to vector<8x16xf32>
    %55 = vector.extract_strided_slice %34 {offsets = [0, 48], sizes = [8, 16], strides = [1, 1]} : vector<16x96xf32> to vector<8x16xf32>
    %56 = vector.extract_strided_slice %34 {offsets = [0, 80], sizes = [8, 16], strides = [1, 1]} : vector<16x96xf32> to vector<8x16xf32>
    %cst_25 = arith.constant dense<0.000000e+00> : vector<8x8xf32>
    %57 = tpu.matmul %54, %55, %cst_25 {dimension_numbers = #tpu.dot_dimension_numbers<[1], [1], [0], [0], [0, 0, 1, 0], [], []>} : vector<8x16xf32>, vector<8x16xf32>, vector<8x8xf32> -> vector<8x8xf32>
    %cst_26 = arith.constant 2.500000e-01 : f32
    %58 = vector.broadcast %cst_26 : f32 to vector<8x8xf32>
    %59 = arith.mulf %57, %58 : vector<8x8xf32>
    %60 = vector.broadcast %35 : vector<1x8xf32> to vector<8x8xf32>
    %61 = arith.addf %59, %60 : vector<8x8xf32>
    %cst_27 = arith.constant dense<0xFF800000> : vector<8xf32>
    %62 = vector.multi_reduction <maximumf>, %61, %cst_27 [1] : vector<8x8xf32> to vector<8xf32>
    %63 = vector.shape_cast %62 : vector<8xf32> to vector<8x1xf32>
    %64 = vector.broadcast %63 : vector<8x1xf32> to vector<8x8xf32>
    %65 = arith.subf %61, %64 : vector<8x8xf32>
    %66 = math.exp %65 : vector<8x8xf32>
    %cst_28 = arith.constant dense<0.000000e+00> : vector<8xf32>
    %67 = vector.multi_reduction <add>, %66, %cst_28 [1] : vector<8x8xf32> to vector<8xf32>
    %68 = vector.shape_cast %67 : vector<8xf32> to vector<8x1xf32>
    %69 = vector.broadcast %68 : vector<8x1xf32> to vector<8x8xf32>
    %70 = arith.divf %66, %69 : vector<8x8xf32>
    %cst_29 = arith.constant dense<0.000000e+00> : vector<8x16xf32>
    %71 = tpu.matmul %70, %56, %cst_29 {dimension_numbers = #tpu.dot_dimension_numbers<[1], [0], [0], [1], [0, 0, 1, 1], [], []>} : vector<8x8xf32>, vector<8x16xf32>, vector<8x16xf32> -> vector<8x16xf32>
    %72 = tpu.concatenate %53, %71 in 1 : vector<8x16xf32>, vector<8x16xf32> -> vector<8x32xf32>
    %73 = vector.extract_strided_slice %27 {offsets = [1, 0], sizes = [1, 8], strides = [1, 1]} : vector<2x8xf32> to vector<1x8xf32>
    %74 = vector.extract_strided_slice %34 {offsets = [8, 0], sizes = [8, 16], strides = [1, 1]} : vector<16x96xf32> to vector<8x16xf32>
    %75 = vector.extract_strided_slice %34 {offsets = [8, 32], sizes = [8, 16], strides = [1, 1]} : vector<16x96xf32> to vector<8x16xf32>
    %76 = vector.extract_strided_slice %34 {offsets = [8, 64], sizes = [8, 16], strides = [1, 1]} : vector<16x96xf32> to vector<8x16xf32>
    %cst_30 = arith.constant dense<0.000000e+00> : vector<8x8xf32>
    %77 = tpu.matmul %74, %75, %cst_30 {dimension_numbers = #tpu.dot_dimension_numbers<[1], [1], [0], [0], [0, 0, 1, 0], [], []>} : vector<8x16xf32>, vector<8x16xf32>, vector<8x8xf32> -> vector<8x8xf32>
    %cst_31 = arith.constant 2.500000e-01 : f32
    %78 = vector.broadcast %cst_31 : f32 to vector<8x8xf32>
    %79 = arith.mulf %77, %78 : vector<8x8xf32>
    %80 = vector.broadcast %73 : vector<1x8xf32> to vector<8x8xf32>
    %81 = arith.addf %79, %80 : vector<8x8xf32>
    %cst_32 = arith.constant dense<0xFF800000> : vector<8xf32>
    %82 = vector.multi_reduction <maximumf>, %81, %cst_32 [1] : vector<8x8xf32> to vector<8xf32>
    %83 = vector.shape_cast %82 : vector<8xf32> to vector<8x1xf32>
    %84 = vector.broadcast %83 : vector<8x1xf32> to vector<8x8xf32>
    %85 = arith.subf %81, %84 : vector<8x8xf32>
    %86 = math.exp %85 : vector<8x8xf32>
    %cst_33 = arith.constant dense<0.000000e+00> : vector<8xf32>
    %87 = vector.multi_reduction <add>, %86, %cst_33 [1] : vector<8x8xf32> to vector<8xf32>
    %88 = vector.shape_cast %87 : vector<8xf32> to vector<8x1xf32>
    %89 = vector.broadcast %88 : vector<8x1xf32> to vector<8x8xf32>
    %90 = arith.divf %86, %89 : vector<8x8xf32>
    %cst_34 = arith.constant dense<0.000000e+00> : vector<8x16xf32>
    %91 = tpu.matmul %90, %76, %cst_34 {dimension_numbers = #tpu.dot_dimension_numbers<[1], [0], [0], [1], [0, 0, 1, 1], [], []>} : vector<8x8xf32>, vector<8x16xf32>, vector<8x16xf32> -> vector<8x16xf32>
    %92 = vector.extract_strided_slice %34 {offsets = [8, 16], sizes = [8, 16], strides = [1, 1]} : vector<16x96xf32> to vector<8x16xf32>
    %93 = vector.extract_strided_slice %34 {offsets = [8, 48], sizes = [8, 16], strides = [1, 1]} : vector<16x96xf32> to vector<8x16xf32>
    %94 = vector.extract_strided_slice %34 {offsets = [8, 80], sizes = [8, 16], strides = [1, 1]} : vector<16x96xf32> to vector<8x16xf32>
    %cst_35 = arith.constant dense<0.000000e+00> : vector<8x8xf32>
    %95 = tpu.matmul %92, %93, %cst_35 {dimension_numbers = #tpu.dot_dimension_numbers<[1], [1], [0], [0], [0, 0, 1, 0], [], []>} : vector<8x16xf32>, vector<8x16xf32>, vector<8x8xf32> -> vector<8x8xf32>
    %cst_36 = arith.constant 2.500000e-01 : f32
    %96 = vector.broadcast %cst_36 : f32 to vector<8x8xf32>
    %97 = arith.mulf %95, %96 : vector<8x8xf32>
    %98 = vector.broadcast %73 : vector<1x8xf32> to vector<8x8xf32>
    %99 = arith.addf %97, %98 : vector<8x8xf32>
    %cst_37 = arith.constant dense<0xFF800000> : vector<8xf32>
    %100 = vector.multi_reduction <maximumf>, %99, %cst_37 [1] : vector<8x8xf32> to vector<8xf32>
    %101 = vector.shape_cast %100 : vector<8xf32> to vector<8x1xf32>
    %102 = vector.broadcast %101 : vector<8x1xf32> to vector<8x8xf32>
    %103 = arith.subf %99, %102 : vector<8x8xf32>
    %104 = math.exp %103 : vector<8x8xf32>
    %cst_38 = arith.constant dense<0.000000e+00> : vector<8xf32>
    %105 = vector.multi_reduction <add>, %104, %cst_38 [1] : vector<8x8xf32> to vector<8xf32>
    %106 = vector.shape_cast %105 : vector<8xf32> to vector<8x1xf32>
    %107 = vector.broadcast %106 : vector<8x1xf32> to vector<8x8xf32>
    %108 = arith.divf %104, %107 : vector<8x8xf32>
    %cst_39 = arith.constant dense<0.000000e+00> : vector<8x16xf32>
    %109 = tpu.matmul %108, %94, %cst_39 {dimension_numbers = #tpu.dot_dimension_numbers<[1], [0], [0], [1], [0, 0, 1, 1], [], []>} : vector<8x8xf32>, vector<8x16xf32>, vector<8x16xf32> -> vector<8x16xf32>
    %110 = tpu.concatenate %91, %109 in 1 : vector<8x16xf32>, vector<8x16xf32> -> vector<8x32xf32>
    %111 = tpu.concatenate %72, %110 in 0 : vector<8x32xf32>, vector<8x32xf32> -> vector<16x32xf32>
    %c0_40 = arith.constant 0 : index
    %c0_41 = arith.constant 0 : index
    %c0_42 = arith.constant 0 : index
    %112 = vector.load %arg7[%c0_40, %c0_41, %c0_42] : memref<2x32x32xf32, #tpu.memory_space<vmem>>, vector<1x32x32xf32>
    %113 = vector.shape_cast %112 : vector<1x32x32xf32> to vector<32x32xf32>
    %cst_43 = arith.constant dense<0.000000e+00> : vector<16x32xf32>
    %114 = tpu.matmul %111, %113, %cst_43 {dimension_numbers = #tpu.dot_dimension_numbers<[1], [0], [0], [1], [0, 0, 1, 1], [], []>} : vector<16x32xf32>, vector<32x32xf32>, vector<16x32xf32> -> vector<16x32xf32>
    %c0_44 = arith.constant 0 : index
    %c0_45 = arith.constant 0 : index
    %c0_46 = arith.constant 0 : index
    %115 = vector.load %arg8[%c0_44, %c0_45, %c0_46] : memref<2x1x32xf32, #tpu.memory_space<vmem>>, vector<1x1x32xf32>
    %116 = vector.shape_cast %115 : vector<1x1x32xf32> to vector<1x32xf32>
    %117 = vector.broadcast %116 : vector<1x32xf32> to vector<16x32xf32>
    %118 = arith.addf %114, %117 : vector<16x32xf32>
    %119 = arith.addf %118, %22 : vector<16x32xf32>
    %c0_47 = arith.constant 0 : index
    %c0_48 = arith.constant 0 : index
    %c0_49 = arith.constant 0 : index
    %120 = vector.load %arg9[%c0_47, %c0_48, %c0_49] : memref<2x1x32xf32, #tpu.memory_space<vmem>>, vector<1x1x32xf32>
    %121 = vector.shape_cast %120 : vector<1x1x32xf32> to vector<1x32xf32>
    %c0_50 = arith.constant 0 : index
    %c0_51 = arith.constant 0 : index
    %c0_52 = arith.constant 0 : index
    %122 = vector.load %arg10[%c0_50, %c0_51, %c0_52] : memref<2x1x32xf32, #tpu.memory_space<vmem>>, vector<1x1x32xf32>
    %123 = vector.shape_cast %122 : vector<1x1x32xf32> to vector<1x32xf32>
    %cst_53 = arith.constant dense<0.000000e+00> : vector<16xf32>
    %124 = vector.multi_reduction <add>, %119, %cst_53 [1] : vector<16x32xf32> to vector<16xf32>
    %125 = vector.shape_cast %124 : vector<16xf32> to vector<16x1xf32>
    %cst_54 = arith.constant 3.200000e+01 : f32
    %126 = vector.broadcast %cst_54 : f32 to vector<16x1xf32>
    %127 = arith.divf %125, %126 : vector<16x1xf32>
    %128 = vector.broadcast %127 : vector<16x1xf32> to vector<16x32xf32>
    %129 = arith.subf %119, %128 : vector<16x32xf32>
    %130 = arith.mulf %129, %129 : vector<16x32xf32>
    %cst_55 = arith.constant dense<0.000000e+00> : vector<16xf32>
    %131 = vector.multi_reduction <add>, %130, %cst_55 [1] : vector<16x32xf32> to vector<16xf32>
    %132 = vector.shape_cast %131 : vector<16xf32> to vector<16x1xf32>
    %cst_56 = arith.constant 3.200000e+01 : f32
    %133 = vector.broadcast %cst_56 : f32 to vector<16x1xf32>
    %134 = arith.divf %132, %133 : vector<16x1xf32>
    %cst_57 = arith.constant 9.99999996E-13 : f32
    %135 = vector.broadcast %cst_57 : f32 to vector<16x1xf32>
    %136 = arith.addf %134, %135 : vector<16x1xf32>
    %137 = math.rsqrt %136 : vector<16x1xf32>
    %138 = vector.broadcast %137 : vector<16x1xf32> to vector<16x32xf32>
    %139 = arith.mulf %129, %138 : vector<16x32xf32>
    %140 = vector.broadcast %121 : vector<1x32xf32> to vector<16x32xf32>
    %141 = arith.mulf %139, %140 : vector<16x32xf32>
    %142 = vector.broadcast %123 : vector<1x32xf32> to vector<16x32xf32>
    %143 = arith.addf %141, %142 : vector<16x32xf32>
    %c0_58 = arith.constant 0 : index
    %c0_59 = arith.constant 0 : index
    %c0_60 = arith.constant 0 : index
    %144 = vector.load %arg11[%c0_58, %c0_59, %c0_60] : memref<2x32x64xf32, #tpu.memory_space<vmem>>, vector<1x32x64xf32>
    %145 = vector.shape_cast %144 : vector<1x32x64xf32> to vector<32x64xf32>
    %cst_61 = arith.constant dense<0.000000e+00> : vector<16x64xf32>
    %146 = tpu.matmul %143, %145, %cst_61 {dimension_numbers = #tpu.dot_dimension_numbers<[1], [0], [0], [1], [0, 0, 1, 1], [], []>} : vector<16x32xf32>, vector<32x64xf32>, vector<16x64xf32> -> vector<16x64xf32>
    %c0_62 = arith.constant 0 : index
    %c0_63 = arith.constant 0 : index
    %c0_64 = arith.constant 0 : index
    %147 = vector.load %arg12[%c0_62, %c0_63, %c0_64] : memref<2x1x64xf32, #tpu.memory_space<vmem>>, vector<1x1x64xf32>
    %148 = vector.shape_cast %147 : vector<1x1x64xf32> to vector<1x64xf32>
    %149 = vector.broadcast %148 : vector<1x64xf32> to vector<16x64xf32>
    %150 = arith.addf %146, %149 : vector<16x64xf32>
    %cst_65 = arith.constant 5.000000e-01 : f32
    %151 = vector.broadcast %cst_65 : f32 to vector<16x64xf32>
    %152 = arith.mulf %151, %150 : vector<16x64xf32>
    %cst_66 = arith.constant 4.471500e-02 : f32
    %153 = vector.broadcast %cst_66 : f32 to vector<16x64xf32>
    %154 = arith.mulf %153, %150 : vector<16x64xf32>
    %155 = arith.mulf %154, %150 : vector<16x64xf32>
    %156 = arith.mulf %155, %150 : vector<16x64xf32>
    %157 = arith.addf %150, %156 : vector<16x64xf32>
    %cst_67 = arith.constant 0.797884583 : f32
    %158 = vector.broadcast %cst_67 : f32 to vector<16x64xf32>
    %159 = arith.mulf %158, %157 : vector<16x64xf32>
    %160 = math.tanh %159 : vector<16x64xf32>
    %cst_68 = arith.constant 1.000000e+00 : f32
    %161 = vector.broadcast %cst_68 : f32 to vector<16x64xf32>
    %162 = arith.addf %161, %160 : vector<16x64xf32>
    %163 = arith.mulf %152, %162 : vector<16x64xf32>
    %c0_69 = arith.constant 0 : index
    %c0_70 = arith.constant 0 : index
    %c0_71 = arith.constant 0 : index
    %164 = vector.load %arg13[%c0_69, %c0_70, %c0_71] : memref<2x64x32xf32, #tpu.memory_space<vmem>>, vector<1x64x32xf32>
    %165 = vector.shape_cast %164 : vector<1x64x32xf32> to vector<64x32xf32>
    %cst_72 = arith.constant dense<0.000000e+00> : vector<16x32xf32>
    %166 = tpu.matmul %163, %165, %cst_72 {dimension_numbers = #tpu.dot_dimension_numbers<[1], [0], [0], [1], [0, 0, 1, 1], [], []>} : vector<16x64xf32>, vector<64x32xf32>, vector<16x32xf32> -> vector<16x32xf32>
    %c0_73 = arith.constant 0 : index
    %c0_74 = arith.constant 0 : index
    %c0_75 = arith.constant 0 : index
    %167 = vector.load %arg14[%c0_73, %c0_74, %c0_75] : memref<2x1x32xf32, #tpu.memory_space<vmem>>, vector<1x1x32xf32>
    %168 = vector.shape_cast %167 : vector<1x1x32xf32> to vector<1x32xf32>
    %169 = vector.broadcast %168 : vector<1x32xf32> to vector<16x32xf32>
    %170 = arith.addf %166, %169 : vector<16x32xf32>
    %171 = arith.addf %170, %143 : vector<16x32xf32>
    %c0_76 = arith.constant 0 : index
    %c0_77 = arith.constant 0 : index
    %c0_78 = arith.constant 0 : index
    %172 = vector.load %arg15[%c0_76, %c0_77, %c0_78] : memref<2x1x32xf32, #tpu.memory_space<vmem>>, vector<1x1x32xf32>
    %173 = vector.shape_cast %172 : vector<1x1x32xf32> to vector<1x32xf32>
    %c0_79 = arith.constant 0 : index
    %c0_80 = arith.constant 0 : index
    %c0_81 = arith.constant 0 : index
    %174 = vector.load %arg16[%c0_79, %c0_80, %c0_81] : memref<2x1x32xf32, #tpu.memory_space<vmem>>, vector<1x1x32xf32>
    %175 = vector.shape_cast %174 : vector<1x1x32xf32> to vector<1x32xf32>
    %cst_82 = arith.constant dense<0.000000e+00> : vector<16xf32>
    %176 = vector.multi_reduction <add>, %171, %cst_82 [1] : vector<16x32xf32> to vector<16xf32>
    %177 = vector.shape_cast %176 : vector<16xf32> to vector<16x1xf32>
    %cst_83 = arith.constant 3.200000e+01 : f32
    %178 = vector.broadcast %cst_83 : f32 to vector<16x1xf32>
    %179 = arith.divf %177, %178 : vector<16x1xf32>
    %180 = vector.broadcast %179 : vector<16x1xf32> to vector<16x32xf32>
    %181 = arith.subf %171, %180 : vector<16x32xf32>
    %182 = arith.mulf %181, %181 : vector<16x32xf32>
    %cst_84 = arith.constant dense<0.000000e+00> : vector<16xf32>
    %183 = vector.multi_reduction <add>, %182, %cst_84 [1] : vector<16x32xf32> to vector<16xf32>
    %184 = vector.shape_cast %183 : vector<16xf32> to vector<16x1xf32>
    %cst_85 = arith.constant 3.200000e+01 : f32
    %185 = vector.broadcast %cst_85 : f32 to vector<16x1xf32>
    %186 = arith.divf %184, %185 : vector<16x1xf32>
    %cst_86 = arith.constant 9.99999996E-13 : f32
    %187 = vector.broadcast %cst_86 : f32 to vector<16x1xf32>
    %188 = arith.addf %186, %187 : vector<16x1xf32>
    %189 = math.rsqrt %188 : vector<16x1xf32>
    %190 = vector.broadcast %189 : vector<16x1xf32> to vector<16x32xf32>
    %191 = arith.mulf %181, %190 : vector<16x32xf32>
    %192 = vector.broadcast %173 : vector<1x32xf32> to vector<16x32xf32>
    %193 = arith.mulf %191, %192 : vector<16x32xf32>
    %194 = vector.broadcast %175 : vector<1x32xf32> to vector<16x32xf32>
    %195 = arith.addf %193, %194 : vector<16x32xf32>
    %c1 = arith.constant 1 : index
    %c0_87 = arith.constant 0 : index
    %c0_88 = arith.constant 0 : index
    %196 = vector.load %arg5[%c1, %c0_87, %c0_88] : memref<2x32x96xf32, #tpu.memory_space<vmem>>, vector<1x32x96xf32>
    %197 = vector.shape_cast %196 : vector<1x32x96xf32> to vector<32x96xf32>
    %cst_89 = arith.constant dense<0.000000e+00> : vector<16x96xf32>
    %198 = tpu.matmul %195, %197, %cst_89 {dimension_numbers = #tpu.dot_dimension_numbers<[1], [0], [0], [1], [0, 0, 1, 1], [], []>} : vector<16x32xf32>, vector<32x96xf32>, vector<16x96xf32> -> vector<16x96xf32>
    %c1_90 = arith.constant 1 : index
    %c0_91 = arith.constant 0 : index
    %c0_92 = arith.constant 0 : index
    %199 = vector.load %arg6[%c1_90, %c0_91, %c0_92] : memref<2x1x96xf32, #tpu.memory_space<vmem>>, vector<1x1x96xf32>
    %200 = vector.shape_cast %199 : vector<1x1x96xf32> to vector<1x96xf32>
    %201 = vector.broadcast %200 : vector<1x96xf32> to vector<16x96xf32>
    %202 = arith.addf %198, %201 : vector<16x96xf32>
    %203 = vector.extract_strided_slice %27 {offsets = [0, 0], sizes = [1, 8], strides = [1, 1]} : vector<2x8xf32> to vector<1x8xf32>
    %204 = vector.extract_strided_slice %202 {offsets = [0, 0], sizes = [8, 16], strides = [1, 1]} : vector<16x96xf32> to vector<8x16xf32>
    %205 = vector.extract_strided_slice %202 {offsets = [0, 32], sizes = [8, 16], strides = [1, 1]} : vector<16x96xf32> to vector<8x16xf32>
    %206 = vector.extract_strided_slice %202 {offsets = [0, 64], sizes = [8, 16], strides = [1, 1]} : vector<16x96xf32> to vector<8x16xf32>
    %cst_93 = arith.constant dense<0.000000e+00> : vector<8x8xf32>
    %207 = tpu.matmul %204, %205, %cst_93 {dimension_numbers = #tpu.dot_dimension_numbers<[1], [1], [0], [0], [0, 0, 1, 0], [], []>} : vector<8x16xf32>, vector<8x16xf32>, vector<8x8xf32> -> vector<8x8xf32>
    %cst_94 = arith.constant 2.500000e-01 : f32
    %208 = vector.broadcast %cst_94 : f32 to vector<8x8xf32>
    %209 = arith.mulf %207, %208 : vector<8x8xf32>
    %210 = vector.broadcast %203 : vector<1x8xf32> to vector<8x8xf32>
    %211 = arith.addf %209, %210 : vector<8x8xf32>
    %cst_95 = arith.constant dense<0xFF800000> : vector<8xf32>
    %212 = vector.multi_reduction <maximumf>, %211, %cst_95 [1] : vector<8x8xf32> to vector<8xf32>
    %213 = vector.shape_cast %212 : vector<8xf32> to vector<8x1xf32>
    %214 = vector.broadcast %213 : vector<8x1xf32> to vector<8x8xf32>
    %215 = arith.subf %211, %214 : vector<8x8xf32>
    %216 = math.exp %215 : vector<8x8xf32>
    %cst_96 = arith.constant dense<0.000000e+00> : vector<8xf32>
    %217 = vector.multi_reduction <add>, %216, %cst_96 [1] : vector<8x8xf32> to vector<8xf32>
    %218 = vector.shape_cast %217 : vector<8xf32> to vector<8x1xf32>
    %219 = vector.broadcast %218 : vector<8x1xf32> to vector<8x8xf32>
    %220 = arith.divf %216, %219 : vector<8x8xf32>
    %cst_97 = arith.constant dense<0.000000e+00> : vector<8x16xf32>
    %221 = tpu.matmul %220, %206, %cst_97 {dimension_numbers = #tpu.dot_dimension_numbers<[1], [0], [0], [1], [0, 0, 1, 1], [], []>} : vector<8x8xf32>, vector<8x16xf32>, vector<8x16xf32> -> vector<8x16xf32>
    %222 = vector.extract_strided_slice %202 {offsets = [0, 16], sizes = [8, 16], strides = [1, 1]} : vector<16x96xf32> to vector<8x16xf32>
    %223 = vector.extract_strided_slice %202 {offsets = [0, 48], sizes = [8, 16], strides = [1, 1]} : vector<16x96xf32> to vector<8x16xf32>
    %224 = vector.extract_strided_slice %202 {offsets = [0, 80], sizes = [8, 16], strides = [1, 1]} : vector<16x96xf32> to vector<8x16xf32>
    %cst_98 = arith.constant dense<0.000000e+00> : vector<8x8xf32>
    %225 = tpu.matmul %222, %223, %cst_98 {dimension_numbers = #tpu.dot_dimension_numbers<[1], [1], [0], [0], [0, 0, 1, 0], [], []>} : vector<8x16xf32>, vector<8x16xf32>, vector<8x8xf32> -> vector<8x8xf32>
    %cst_99 = arith.constant 2.500000e-01 : f32
    %226 = vector.broadcast %cst_99 : f32 to vector<8x8xf32>
    %227 = arith.mulf %225, %226 : vector<8x8xf32>
    %228 = vector.broadcast %203 : vector<1x8xf32> to vector<8x8xf32>
    %229 = arith.addf %227, %228 : vector<8x8xf32>
    %cst_100 = arith.constant dense<0xFF800000> : vector<8xf32>
    %230 = vector.multi_reduction <maximumf>, %229, %cst_100 [1] : vector<8x8xf32> to vector<8xf32>
    %231 = vector.shape_cast %230 : vector<8xf32> to vector<8x1xf32>
    %232 = vector.broadcast %231 : vector<8x1xf32> to vector<8x8xf32>
    %233 = arith.subf %229, %232 : vector<8x8xf32>
    %234 = math.exp %233 : vector<8x8xf32>
    %cst_101 = arith.constant dense<0.000000e+00> : vector<8xf32>
    %235 = vector.multi_reduction <add>, %234, %cst_101 [1] : vector<8x8xf32> to vector<8xf32>
    %236 = vector.shape_cast %235 : vector<8xf32> to vector<8x1xf32>
    %237 = vector.broadcast %236 : vector<8x1xf32> to vector<8x8xf32>
    %238 = arith.divf %234, %237 : vector<8x8xf32>
    %cst_102 = arith.constant dense<0.000000e+00> : vector<8x16xf32>
    %239 = tpu.matmul %238, %224, %cst_102 {dimension_numbers = #tpu.dot_dimension_numbers<[1], [0], [0], [1], [0, 0, 1, 1], [], []>} : vector<8x8xf32>, vector<8x16xf32>, vector<8x16xf32> -> vector<8x16xf32>
    %240 = tpu.concatenate %221, %239 in 1 : vector<8x16xf32>, vector<8x16xf32> -> vector<8x32xf32>
    %241 = vector.extract_strided_slice %27 {offsets = [1, 0], sizes = [1, 8], strides = [1, 1]} : vector<2x8xf32> to vector<1x8xf32>
    %242 = vector.extract_strided_slice %202 {offsets = [8, 0], sizes = [8, 16], strides = [1, 1]} : vector<16x96xf32> to vector<8x16xf32>
    %243 = vector.extract_strided_slice %202 {offsets = [8, 32], sizes = [8, 16], strides = [1, 1]} : vector<16x96xf32> to vector<8x16xf32>
    %244 = vector.extract_strided_slice %202 {offsets = [8, 64], sizes = [8, 16], strides = [1, 1]} : vector<16x96xf32> to vector<8x16xf32>
    %cst_103 = arith.constant dense<0.000000e+00> : vector<8x8xf32>
    %245 = tpu.matmul %242, %243, %cst_103 {dimension_numbers = #tpu.dot_dimension_numbers<[1], [1], [0], [0], [0, 0, 1, 0], [], []>} : vector<8x16xf32>, vector<8x16xf32>, vector<8x8xf32> -> vector<8x8xf32>
    %cst_104 = arith.constant 2.500000e-01 : f32
    %246 = vector.broadcast %cst_104 : f32 to vector<8x8xf32>
    %247 = arith.mulf %245, %246 : vector<8x8xf32>
    %248 = vector.broadcast %241 : vector<1x8xf32> to vector<8x8xf32>
    %249 = arith.addf %247, %248 : vector<8x8xf32>
    %cst_105 = arith.constant dense<0xFF800000> : vector<8xf32>
    %250 = vector.multi_reduction <maximumf>, %249, %cst_105 [1] : vector<8x8xf32> to vector<8xf32>
    %251 = vector.shape_cast %250 : vector<8xf32> to vector<8x1xf32>
    %252 = vector.broadcast %251 : vector<8x1xf32> to vector<8x8xf32>
    %253 = arith.subf %249, %252 : vector<8x8xf32>
    %254 = math.exp %253 : vector<8x8xf32>
    %cst_106 = arith.constant dense<0.000000e+00> : vector<8xf32>
    %255 = vector.multi_reduction <add>, %254, %cst_106 [1] : vector<8x8xf32> to vector<8xf32>
    %256 = vector.shape_cast %255 : vector<8xf32> to vector<8x1xf32>
    %257 = vector.broadcast %256 : vector<8x1xf32> to vector<8x8xf32>
    %258 = arith.divf %254, %257 : vector<8x8xf32>
    %cst_107 = arith.constant dense<0.000000e+00> : vector<8x16xf32>
    %259 = tpu.matmul %258, %244, %cst_107 {dimension_numbers = #tpu.dot_dimension_numbers<[1], [0], [0], [1], [0, 0, 1, 1], [], []>} : vector<8x8xf32>, vector<8x16xf32>, vector<8x16xf32> -> vector<8x16xf32>
    %260 = vector.extract_strided_slice %202 {offsets = [8, 16], sizes = [8, 16], strides = [1, 1]} : vector<16x96xf32> to vector<8x16xf32>
    %261 = vector.extract_strided_slice %202 {offsets = [8, 48], sizes = [8, 16], strides = [1, 1]} : vector<16x96xf32> to vector<8x16xf32>
    %262 = vector.extract_strided_slice %202 {offsets = [8, 80], sizes = [8, 16], strides = [1, 1]} : vector<16x96xf32> to vector<8x16xf32>
    %cst_108 = arith.constant dense<0.000000e+00> : vector<8x8xf32>
    %263 = tpu.matmul %260, %261, %cst_108 {dimension_numbers = #tpu.dot_dimension_numbers<[1], [1], [0], [0], [0, 0, 1, 0], [], []>} : vector<8x16xf32>, vector<8x16xf32>, vector<8x8xf32> -> vector<8x8xf32>
    %cst_109 = arith.constant 2.500000e-01 : f32
    %264 = vector.broadcast %cst_109 : f32 to vector<8x8xf32>
    %265 = arith.mulf %263, %264 : vector<8x8xf32>
    %266 = vector.broadcast %241 : vector<1x8xf32> to vector<8x8xf32>
    %267 = arith.addf %265, %266 : vector<8x8xf32>
    %cst_110 = arith.constant dense<0xFF800000> : vector<8xf32>
    %268 = vector.multi_reduction <maximumf>, %267, %cst_110 [1] : vector<8x8xf32> to vector<8xf32>
    %269 = vector.shape_cast %268 : vector<8xf32> to vector<8x1xf32>
    %270 = vector.broadcast %269 : vector<8x1xf32> to vector<8x8xf32>
    %271 = arith.subf %267, %270 : vector<8x8xf32>
    %272 = math.exp %271 : vector<8x8xf32>
    %cst_111 = arith.constant dense<0.000000e+00> : vector<8xf32>
    %273 = vector.multi_reduction <add>, %272, %cst_111 [1] : vector<8x8xf32> to vector<8xf32>
    %274 = vector.shape_cast %273 : vector<8xf32> to vector<8x1xf32>
    %275 = vector.broadcast %274 : vector<8x1xf32> to vector<8x8xf32>
    %276 = arith.divf %272, %275 : vector<8x8xf32>
    %cst_112 = arith.constant dense<0.000000e+00> : vector<8x16xf32>
    %277 = tpu.matmul %276, %262, %cst_112 {dimension_numbers = #tpu.dot_dimension_numbers<[1], [0], [0], [1], [0, 0, 1, 1], [], []>} : vector<8x8xf32>, vector<8x16xf32>, vector<8x16xf32> -> vector<8x16xf32>
    %278 = tpu.concatenate %259, %277 in 1 : vector<8x16xf32>, vector<8x16xf32> -> vector<8x32xf32>
    %279 = tpu.concatenate %240, %278 in 0 : vector<8x32xf32>, vector<8x32xf32> -> vector<16x32xf32>
    %c1_113 = arith.constant 1 : index
    %c0_114 = arith.constant 0 : index
    %c0_115 = arith.constant 0 : index
    %280 = vector.load %arg7[%c1_113, %c0_114, %c0_115] : memref<2x32x32xf32, #tpu.memory_space<vmem>>, vector<1x32x32xf32>
    %281 = vector.shape_cast %280 : vector<1x32x32xf32> to vector<32x32xf32>
    %cst_116 = arith.constant dense<0.000000e+00> : vector<16x32xf32>
    %282 = tpu.matmul %279, %281, %cst_116 {dimension_numbers = #tpu.dot_dimension_numbers<[1], [0], [0], [1], [0, 0, 1, 1], [], []>} : vector<16x32xf32>, vector<32x32xf32>, vector<16x32xf32> -> vector<16x32xf32>
    %c1_117 = arith.constant 1 : index
    %c0_118 = arith.constant 0 : index
    %c0_119 = arith.constant 0 : index
    %283 = vector.load %arg8[%c1_117, %c0_118, %c0_119] : memref<2x1x32xf32, #tpu.memory_space<vmem>>, vector<1x1x32xf32>
    %284 = vector.shape_cast %283 : vector<1x1x32xf32> to vector<1x32xf32>
    %285 = vector.broadcast %284 : vector<1x32xf32> to vector<16x32xf32>
    %286 = arith.addf %282, %285 : vector<16x32xf32>
    %287 = arith.addf %286, %195 : vector<16x32xf32>
    %c1_120 = arith.constant 1 : index
    %c0_121 = arith.constant 0 : index
    %c0_122 = arith.constant 0 : index
    %288 = vector.load %arg9[%c1_120, %c0_121, %c0_122] : memref<2x1x32xf32, #tpu.memory_space<vmem>>, vector<1x1x32xf32>
    %289 = vector.shape_cast %288 : vector<1x1x32xf32> to vector<1x32xf32>
    %c1_123 = arith.constant 1 : index
    %c0_124 = arith.constant 0 : index
    %c0_125 = arith.constant 0 : index
    %290 = vector.load %arg10[%c1_123, %c0_124, %c0_125] : memref<2x1x32xf32, #tpu.memory_space<vmem>>, vector<1x1x32xf32>
    %291 = vector.shape_cast %290 : vector<1x1x32xf32> to vector<1x32xf32>
    %cst_126 = arith.constant dense<0.000000e+00> : vector<16xf32>
    %292 = vector.multi_reduction <add>, %287, %cst_126 [1] : vector<16x32xf32> to vector<16xf32>
    %293 = vector.shape_cast %292 : vector<16xf32> to vector<16x1xf32>
    %cst_127 = arith.constant 3.200000e+01 : f32
    %294 = vector.broadcast %cst_127 : f32 to vector<16x1xf32>
    %295 = arith.divf %293, %294 : vector<16x1xf32>
    %296 = vector.broadcast %295 : vector<16x1xf32> to vector<16x32xf32>
    %297 = arith.subf %287, %296 : vector<16x32xf32>
    %298 = arith.mulf %297, %297 : vector<16x32xf32>
    %cst_128 = arith.constant dense<0.000000e+00> : vector<16xf32>
    %299 = vector.multi_reduction <add>, %298, %cst_128 [1] : vector<16x32xf32> to vector<16xf32>
    %300 = vector.shape_cast %299 : vector<16xf32> to vector<16x1xf32>
    %cst_129 = arith.constant 3.200000e+01 : f32
    %301 = vector.broadcast %cst_129 : f32 to vector<16x1xf32>
    %302 = arith.divf %300, %301 : vector<16x1xf32>
    %cst_130 = arith.constant 9.99999996E-13 : f32
    %303 = vector.broadcast %cst_130 : f32 to vector<16x1xf32>
    %304 = arith.addf %302, %303 : vector<16x1xf32>
    %305 = math.rsqrt %304 : vector<16x1xf32>
    %306 = vector.broadcast %305 : vector<16x1xf32> to vector<16x32xf32>
    %307 = arith.mulf %297, %306 : vector<16x32xf32>
    %308 = vector.broadcast %289 : vector<1x32xf32> to vector<16x32xf32>
    %309 = arith.mulf %307, %308 : vector<16x32xf32>
    %310 = vector.broadcast %291 : vector<1x32xf32> to vector<16x32xf32>
    %311 = arith.addf %309, %310 : vector<16x32xf32>
    %c1_131 = arith.constant 1 : index
    %c0_132 = arith.constant 0 : index
    %c0_133 = arith.constant 0 : index
    %312 = vector.load %arg11[%c1_131, %c0_132, %c0_133] : memref<2x32x64xf32, #tpu.memory_space<vmem>>, vector<1x32x64xf32>
    %313 = vector.shape_cast %312 : vector<1x32x64xf32> to vector<32x64xf32>
    %cst_134 = arith.constant dense<0.000000e+00> : vector<16x64xf32>
    %314 = tpu.matmul %311, %313, %cst_134 {dimension_numbers = #tpu.dot_dimension_numbers<[1], [0], [0], [1], [0, 0, 1, 1], [], []>} : vector<16x32xf32>, vector<32x64xf32>, vector<16x64xf32> -> vector<16x64xf32>
    %c1_135 = arith.constant 1 : index
    %c0_136 = arith.constant 0 : index
    %c0_137 = arith.constant 0 : index
    %315 = vector.load %arg12[%c1_135, %c0_136, %c0_137] : memref<2x1x64xf32, #tpu.memory_space<vmem>>, vector<1x1x64xf32>
    %316 = vector.shape_cast %315 : vector<1x1x64xf32> to vector<1x64xf32>
    %317 = vector.broadcast %316 : vector<1x64xf32> to vector<16x64xf32>
    %318 = arith.addf %314, %317 : vector<16x64xf32>
    %cst_138 = arith.constant 5.000000e-01 : f32
    %319 = vector.broadcast %cst_138 : f32 to vector<16x64xf32>
    %320 = arith.mulf %319, %318 : vector<16x64xf32>
    %cst_139 = arith.constant 4.471500e-02 : f32
    %321 = vector.broadcast %cst_139 : f32 to vector<16x64xf32>
    %322 = arith.mulf %321, %318 : vector<16x64xf32>
    %323 = arith.mulf %322, %318 : vector<16x64xf32>
    %324 = arith.mulf %323, %318 : vector<16x64xf32>
    %325 = arith.addf %318, %324 : vector<16x64xf32>
    %cst_140 = arith.constant 0.797884583 : f32
    %326 = vector.broadcast %cst_140 : f32 to vector<16x64xf32>
    %327 = arith.mulf %326, %325 : vector<16x64xf32>
    %328 = math.tanh %327 : vector<16x64xf32>
    %cst_141 = arith.constant 1.000000e+00 : f32
    %329 = vector.broadcast %cst_141 : f32 to vector<16x64xf32>
    %330 = arith.addf %329, %328 : vector<16x64xf32>
    %331 = arith.mulf %320, %330 : vector<16x64xf32>
    %c1_142 = arith.constant 1 : index
    %c0_143 = arith.constant 0 : index
    %c0_144 = arith.constant 0 : index
    %332 = vector.load %arg13[%c1_142, %c0_143, %c0_144] : memref<2x64x32xf32, #tpu.memory_space<vmem>>, vector<1x64x32xf32>
    %333 = vector.shape_cast %332 : vector<1x64x32xf32> to vector<64x32xf32>
    %cst_145 = arith.constant dense<0.000000e+00> : vector<16x32xf32>
    %334 = tpu.matmul %331, %333, %cst_145 {dimension_numbers = #tpu.dot_dimension_numbers<[1], [0], [0], [1], [0, 0, 1, 1], [], []>} : vector<16x64xf32>, vector<64x32xf32>, vector<16x32xf32> -> vector<16x32xf32>
    %c1_146 = arith.constant 1 : index
    %c0_147 = arith.constant 0 : index
    %c0_148 = arith.constant 0 : index
    %335 = vector.load %arg14[%c1_146, %c0_147, %c0_148] : memref<2x1x32xf32, #tpu.memory_space<vmem>>, vector<1x1x32xf32>
    %336 = vector.shape_cast %335 : vector<1x1x32xf32> to vector<1x32xf32>
    %337 = vector.broadcast %336 : vector<1x32xf32> to vector<16x32xf32>
    %338 = arith.addf %334, %337 : vector<16x32xf32>
    %339 = arith.addf %338, %311 : vector<16x32xf32>
    %c1_149 = arith.constant 1 : index
    %c0_150 = arith.constant 0 : index
    %c0_151 = arith.constant 0 : index
    %340 = vector.load %arg15[%c1_149, %c0_150, %c0_151] : memref<2x1x32xf32, #tpu.memory_space<vmem>>, vector<1x1x32xf32>
    %341 = vector.shape_cast %340 : vector<1x1x32xf32> to vector<1x32xf32>
    %c1_152 = arith.constant 1 : index
    %c0_153 = arith.constant 0 : index
    %c0_154 = arith.constant 0 : index
    %342 = vector.load %arg16[%c1_152, %c0_153, %c0_154] : memref<2x1x32xf32, #tpu.memory_space<vmem>>, vector<1x1x32xf32>
    %343 = vector.shape_cast %342 : vector<1x1x32xf32> to vector<1x32xf32>
    %cst_155 = arith.constant dense<0.000000e+00> : vector<16xf32>
    %344 = vector.multi_reduction <add>, %339, %cst_155 [1] : vector<16x32xf32> to vector<16xf32>
    %345 = vector.shape_cast %344 : vector<16xf32> to vector<16x1xf32>
    %cst_156 = arith.constant 3.200000e+01 : f32
    %346 = vector.broadcast %cst_156 : f32 to vector<16x1xf32>
    %347 = arith.divf %345, %346 : vector<16x1xf32>
    %348 = vector.broadcast %347 : vector<16x1xf32> to vector<16x32xf32>
    %349 = arith.subf %339, %348 : vector<16x32xf32>
    %350 = arith.mulf %349, %349 : vector<16x32xf32>
    %cst_157 = arith.constant dense<0.000000e+00> : vector<16xf32>
    %351 = vector.multi_reduction <add>, %350, %cst_157 [1] : vector<16x32xf32> to vector<16xf32>
    %352 = vector.shape_cast %351 : vector<16xf32> to vector<16x1xf32>
    %cst_158 = arith.constant 3.200000e+01 : f32
    %353 = vector.broadcast %cst_158 : f32 to vector<16x1xf32>
    %354 = arith.divf %352, %353 : vector<16x1xf32>
    %cst_159 = arith.constant 9.99999996E-13 : f32
    %355 = vector.broadcast %cst_159 : f32 to vector<16x1xf32>
    %356 = arith.addf %354, %355 : vector<16x1xf32>
    %357 = math.rsqrt %356 : vector<16x1xf32>
    %358 = vector.broadcast %357 : vector<16x1xf32> to vector<16x32xf32>
    %359 = arith.mulf %349, %358 : vector<16x32xf32>
    %360 = vector.broadcast %341 : vector<1x32xf32> to vector<16x32xf32>
    %361 = arith.mulf %359, %360 : vector<16x32xf32>
    %362 = vector.broadcast %343 : vector<1x32xf32> to vector<16x32xf32>
    %363 = arith.addf %361, %362 : vector<16x32xf32>
    %364 = vector.extract_strided_slice %363 {offsets = [0, 0], sizes = [1, 32], strides = [1, 1]} : vector<16x32xf32> to vector<1x32xf32>
    %365 = vector.extract_strided_slice %363 {offsets = [8, 0], sizes = [1, 32], strides = [1, 1]} : vector<16x32xf32> to vector<1x32xf32>
    %366 = tpu.concatenate %364, %365 in 0 : vector<1x32xf32>, vector<1x32xf32> -> vector<2x32xf32>
    %c0_160 = arith.constant 0 : index
    %c0_161 = arith.constant 0 : index
    %367 = vector.load %arg17[%c0_160, %c0_161] : memref<32x32xf32, #tpu.memory_space<vmem>>, vector<32x32xf32>
    %cst_162 = arith.constant dense<0.000000e+00> : vector<2x32xf32>
    %368 = tpu.matmul %366, %367, %cst_162 {dimension_numbers = #tpu.dot_dimension_numbers<[1], [0], [0], [1], [0, 0, 1, 1], [], []>} : vector<2x32xf32>, vector<32x32xf32>, vector<2x32xf32> -> vector<2x32xf32>
    %c0_163 = arith.constant 0 : index
    %c0_164 = arith.constant 0 : index
    %369 = vector.load %arg18[%c0_163, %c0_164] : memref<1x32xf32, #tpu.memory_space<vmem>>, vector<1x32xf32>
    %370 = vector.broadcast %369 : vector<1x32xf32> to vector<2x32xf32>
    %371 = arith.addf %368, %370 : vector<2x32xf32>
    %372 = math.tanh %371 : vector<2x32xf32>
    %c0_165 = arith.constant 0 : index
    %c0_166 = arith.constant 0 : index
    %373 = vector.load %arg2[%c0_165, %c0_166] : memref<2x32xf32, #tpu.memory_space<vmem>>, vector<2x32xf32>
    %cst_167 = arith.constant 1.000000e-01 : f32
    %374 = vector.broadcast %cst_167 : f32 to vector<2x32xf32>
    %375 = arith.cmpf oge, %373, %374 : vector<2x32xf32>
    %376 = arith.extui %375 : vector<2x32xi1> to vector<2x32xi32>
    %377 = arith.sitofp %376 : vector<2x32xi32> to vector<2x32xf32>
    %378 = arith.mulf %372, %377 : vector<2x32xf32>
    %cst_168 = arith.constant 1.11111116 : f32
    %379 = vector.broadcast %cst_168 : f32 to vector<2x32xf32>
    %380 = arith.mulf %378, %379 : vector<2x32xf32>
    %c0_169 = arith.constant 0 : index
    %c0_170 = arith.constant 0 : index
    %381 = vector.load %arg19[%c0_169, %c0_170] : memref<2x32xf32, #tpu.memory_space<vmem>>, vector<2x32xf32>
    tpu.vector_store %arg19[%c0_169, %c0_170], %380 {strides = array<i32>} : memref<2x32xf32, #tpu.memory_space<vmem>>, vector<2x32xf32>,
    return
  }
}

</mosaic_0001>

<bundles_post_ra>
// kernel: bert_text_processor_forward.1
= control target key start
LH: loop header
LB: loop body
LE: loop exit
PB: predicated region body
PF: predicated region fallthrough
CT: control target
= control target key end

     0   :  { %s3666_s0 = inlined_call_operand.vmem [shape: f32[16,32], index: 0, kind: input, shape index: {}]   ;;  %s3667_s1 = inlined_call_operand.vmem [shape: f32[2,8], index: 1, kind: input, shape index: {}]   ;;  %s3668_s2 = inlined_call_operand.vmem [shape: f32[2,32], index: 2, kind: input, shape index: {}]   ;;  %s3669_s3 = inlined_call_operand.vmem [shape: f32[1,32], index: 3, kind: input, shape index: {}]   ;;  %s3670_s4 = inlined_call_operand.vmem [shape: f32[1,32], index: 4, kind: input, shape index: {}]   ;;  %s3671_s5 = inlined_call_operand.vmem [shape: f32[2,32,96], index: 5, kind: input, shape index: {}]   ;;  %s3672_s6 = inlined_call_operand.vmem [shape: f32[2,1,96], index: 6, kind: input, shape index: {}]   ;;  %s3673_s7 = inlined_call_operand.vmem [shape: f32[2,32,32], index: 7, kind: input, shape index: {}]   ;;  %s3674_s8 = inlined_call_operand.vmem [shape: f32[2,1,32], index: 8, kind: input, shape index: {}]   ;;  %s3675_s9 = inlined_call_operand.vmem [shape: f32[2,1,32], index: 9, kind: input, shape index: {}]   ;;  %s3676_s10 = inlined_call_operand.vmem [shape: f32[2,1,32], index: 10, kind: input, shape index: {}]   ;;  %s3677_s11 = inlined_call_operand.vmem [shape: f32[2,32,64], index: 11, kind: input, shape index: {}]   ;;  %s3678_s12 = inlined_call_operand.vmem [shape: f32[2,1,64], index: 12, kind: input, shape index: {}]   ;;  %s3679_s13 = inlined_call_operand.vmem [shape: f32[2,64,32], index: 13, kind: input, shape index: {}]   ;;  %s3680_s14 = inlined_call_operand.vmem [shape: f32[2,1,32], index: 14, kind: input, shape index: {}]   ;;  %s3681_s15 = inlined_call_operand.vmem [shape: f32[2,1,32], index: 15, kind: input, shape index: {}]   ;;  %s3682_s16 = inlined_call_operand.vmem [shape: f32[2,1,32], index: 16, kind: input, shape index: {}]   ;;  %s3683_s17 = inlined_call_operand.vmem [shape: f32[32,32], index: 17, kind: input, shape index: {}]   ;;  %s3684_s18 = inlined_call_operand.vmem [shape: f32[1,32], index: 18, kind: input, shape index: {}]   ;;  %s3685_s19 = inlined_call_operand.hbm [shape: f32[2,32], index: 19, kind: output, shape index: {}]  }
   0x1   :  { %3687 = sst [smem:[#allocation5_spill]] %s3666_s0 }
   0x2   :  { %3688 = sst [smem:[#allocation6_spill]] %s3667_s1 }
   0x3   :  { %3689 = sst [smem:[#allocation7_spill]] %s3668_s2 }
   0x4   :  { %3690 = sst [smem:[#allocation8_spill]] %s3669_s3 }
   0x5   :  { %s3691_s20 = sld [smem:[#allocation5_spill]]  ;;  %vm67_vm0 = vcmask 261120  }
   0xb   :  { %v63_v0 = vld [vmem:[%s3691_s20] sm:$0xff]  ;;  %v64_v1 = vld [vmem:[%s3691_s20 + $0x8] sm:$0xff] }
   0xc   :  { %24 = vsyncpa [#allocation3], 0  ;;  %v68_v2 = vsel %vm67_vm0, %v63_v0, 0.0  ;;  %v71_v3 = vsel %vm67_vm0, %v64_v1, 0.0  ;;  %v114_v14 = vld [vmem:[%s3671_s5] sm:$0xff]  ;;  %v115_v15 = vld [vmem:[%s3671_s5 + $0x8] sm:$0xff]  ;;  %v285_v45 = vlaneseq }
   0xd   :  { %69 = vadd.xlane.f32.xlu0 %v68_v2  ;;  %v116_v16 = vld [vmem:[%s3671_s5 + $0x10] sm:$0xff]  ;;  %v2942_v17 = vpack.c.bf16 %v115_v15, %v114_v14  ;;  %v117_v18 = vld [vmem:[%s3671_s5 + $0x18] sm:$0xff]  ;;  %s3692_s0 = sld [smem:[#allocation8_spill]]  ;;  %v2566_v29 = vld [vmem:[%s3670_s4] ss:$0 sm:$0xff]  ;;  %v3124_v36 = vmov 0.0  }
   0xe   :  { %v2946_v19 = vpack.c.bf16 %v117_v18, %v116_v16  ;;  %2758 = vmatprep.subr.mxu1 %v3124_v36  ;;  %vm3125_vm1 = vmmov 0   ;;  %v2567_v37 = vld [vmem:[%s3672_s6] ss:$0 sm:$0xff]  ;;  %s3126_s1 = smov 96   ;;  %s3127_s22 = smov 80   ;;  %vm209_vm2 = vcmask 130048  }
   0xf   :  { %2943 = vmatprep.subr.bf16.mxu0 %v2942_v17  ;;  %2760 = vmatprep.mubr.msk.f32.mxu1 %vm3125_vm1, %v3124_v36  ;;  %s3128_s2 = smov 112   ;;  %s3693_s25 = sld [smem:[#allocation6_spill]]  ;;  %v286_v48 = vshrl.u32 %v285_v45, 7  ;;  %vm290_vm3 = vcmask 64512   ;;  %vm1155_vm4 = vcmask 523264   ;;  %vm2456_vm5 = vcmask 1040384  }
  0x10   :  { %2945 = vmatpush3.bf16.msra.mxu0 %v2942_v17  ;;  %s3129_s3 = smov 64   ;;  %s3130_s26 = smov 48   ;;  %vm2549_vm7 = vcmask 254976  }
  0x11   :  { %72 = vadd.xlane.f32.xlu0 %v71_v3  ;;  %2947 = vmatprep.subr.bf16.mxu0 %v2946_v19  ;;  %v287_v50 = vsub.s32 0, %v286_v48  ;;  %v630_v56 = vsub.s32 1, %v286_v48  ;;  %s3131_s23 = smov 16   ;;  %s3133_s4 = smov [#allocation2]  }
  0x13   :  { %v2565_v27 = vld [vmem:[%s3692_s0] ss:$0 sm:$0xff] }
  0x14   :  { %2949 = vmatpush3.bf16.msra.mxu0 %v2946_v19 }
  0x15   :  { %2778 = vmatprep.subr.mxu0 %v3124_v36  ;;  %v111_v46 = vld [vmem:[%s3693_s25] sm:$0x3] }
  0x16   :  { %v112_v47 = vsub.f32 1.0, %v111_v46 }
  0x18   :  { %v113_v49 = vmul.f32 -1e+09, %v112_v47 }
  0x1a   :  { %v3306_v51 = vrot.slane %v113_v49, %v287_v50  ;;  %v3310_v58 = vrot.slane %v113_v49, %v630_v56  ;;  %v893_v56 = vld [vmem:[%s3673_s7 + $0x8] sm:$0xff] }
  0x9a   :  { %v70_v4 = vpop.xlane.xlu0 %69 }
  0x9b   :  { %v75_v5 = vmul.f32 0.03125, %v70_v4 }
  0x9d   :  { %v77_v6 = vsub.f32 %v63_v0, %v75_v5 }
  0x9e   :  { %v73_v7 = vpop.xlane.xlu0 %72 }
  0x9f   :  { %v76_v8 = vmul.f32 0.03125, %v73_v7  ;;  %v79_v9 = vmul.f32 %v77_v6, %v77_v6 }
  0xa1   :  { %v78_v10 = vsub.f32 %v64_v1, %v76_v8  ;;  %v81_v11 = vsel %vm67_vm0, %v79_v9, 0.0 }
  0xa2   :  { %82 = vadd.xlane.f32.xlu1 %v81_v11 }
  0xa3   :  { %v80_v12 = vmul.f32 %v78_v10, %v78_v10 }
  0xa5   :  { %v84_v13 = vsel %vm67_vm0, %v80_v12, 0.0 }
  0xa6   :  { %85 = vadd.xlane.f32.xlu1 %v84_v13 }
 0x12f   :  { %v83_v20 = vpop.xlane.xlu1 %82 }
 0x130   :  { %v87_v21 = vmul.f32 0.03125, %v83_v20 }
 0x132   :  { %v89_v22 = vadd.f32 1e-12, %v87_v21 }
 0x133   :  { %v86_v23 = vpop.xlane.xlu1 %85 }
 0x134   :  { %3038 = vrsqrt.f32 %v89_v22  ;;  %v88_v24 = vmul.f32 0.03125, %v86_v23 }
 0x136   :  { %v90_v25 = vadd.f32 1e-12, %v88_v24 }
 0x138   :  { %3040 = vrsqrt.f32 %v90_v25 }
 0x13e   :  { %v3039_v26 = vpop.eup %3038 }
 0x13f   :  { %v93_v28 = vmul.f32 %v3039_v26, %v77_v6 }
 0x141   :  { %v101_v30 = vmul.f32 %v2565_v27, %v93_v28 }
 0x142   :  { %v3041_v31 = vpop.eup %3040 }
 0x143   :  { %v94_v32 = vmul.f32 %v3041_v31, %v78_v10  ;;  %v3262_v33 = vadd.f32 %v2566_v29, %v101_v30 }
 0x145   :  { %v102_v34 = vmul.f32 %v2565_v27, %v94_v32  ;;  %2755 = vmatprep.mubr.msk.f32.mxu0 %vm67_vm0, %v3262_v33 }
 0x147   :  { %v3266_v35 = vadd.f32 %v2566_v29, %v102_v34 }
 0x149   :  { %2756 = vmatmul.mubr.msk.f32.vlgmr.msra.gmra.mrb[0].mxu0 %vm67_vm0, %v3266_v35 }
 0x14a   :  { %2780 = vmatprep.mubr.msk.f32.mxu0 %vm3125_vm1, %v3124_v36 }
 0x21c   :  { %v2757_v38 = vpop.f32.mrb[0].mxu0 }
 0x21d   :  { %v197_v39 = vpop.f32.mrb[1].mxu0  ;;  %v3285_v41 = vadd.f32 %v2757_v38, %v2567_v37 }
 0x21e   :  { %v3279_v40 = vadd.f32 %v2567_v37, %v197_v39 }
 0x220   :  { %207 = vrot.lane.b32.xlu0 %v3279_v40, %s3126_s1 }
 0x224   :  { %380 = vrot.lane.b32.xlu0 %v3279_v40, %s3127_s22 }
 0x228   :  { %551 = vrot.lane.b32.xlu0 %v3285_v41, %s3126_s1 }
 0x22c   :  { %720 = vrot.lane.b32.xlu0 %v3285_v41, %s3128_s2 }
 0x292   :  { %v208_v42 = vpop.permute.xlu0 %207 }
 0x293   :  { %2759 = vmatpush3.xpose.msk.msra.mxu1 %vm209_vm2, %v208_v42 }
 0x294   :  { %2763 = vmatprep.subr.mxu1 %v3124_v36 }
 0x296   :  { %2761 = vmatmul.mubr.msk.f32.vlgmr.msra.gmra.mrb[0].mxu1 %vm209_vm2, %v3279_v40  ;;  %v381_v43 = vpop.permute.xlu0 %380 }
 0x297   :  { %2765 = vmatprep.mubr.msk.f32.mxu1 %vm3125_vm1, %v3124_v36 }
 0x29a   :  { %v552_v44 = vpop.permute.xlu0 %551 }
 0x29b   :  { %2779 = vmatpush3.xpose.msk.msra.mxu0 %vm209_vm2, %v552_v44 }
 0x29c   :  { %2788 = vmatprep.subr.mxu0 %v3124_v36 }
 0x29e   :  { %2781 = vmatmul.mubr.msk.f32.vlgmr.msra.gmra.mrb[2].mxu0 %vm209_vm2, %v3285_v41  ;;  %v721_v9 = vpop.permute.xlu0 %720 }
 0x29f   :  { %2790 = vmatprep.mubr.msk.f32.mxu0 %vm3125_vm1, %v3124_v36 }
 0x369   :  { %v280_v52 = vpop.f32.mrb[0].mxu1 }
 0x36a   :  { %v284_v53 = vmul.f32 0.25, %v280_v52  ;;  %v2762_v54 = vpop.f32.mrb[1].mxu1 }
 0x36c   :  { %v289_v55 = vadd.f32 %v3306_v51, %v284_v53 }
 0x36e   :  { %v291_v57 = vsel %vm290_vm3, %v289_v55, -inf }
 0x36f   :  { %292 = vmax.xlane.f32.xlu1 %v291_v57 }
 0x371   :  { %v623_v59 = vpop.f32.mrb[2].mxu0 }
 0x372   :  { %v627_v60 = vmul.f32 0.25, %v623_v59  ;;  %v2782_v61 = vpop.f32.mrb[3].mxu0  ;;  %v894_v59 = vld [vmem:[%s3673_s7 + $0x10] sm:$0xff] }
 0x374   :  { %v632_v62 = vadd.f32 %v3310_v58, %v627_v60  ;;  %v895_v60 = vld [vmem:[%s3673_s7 + $0x18] sm:$0xff] }
 0x375   :  { %v2954_v61 = vpack.c.bf16 %v895_v60, %v894_v59  ;;  %v1145_v59 = vld [vmem:[%s3679_s13 + $0x28] sm:$0xff] }
 0x376   :  { %v633_v63 = vsel %vm290_vm3, %v632_v62, -inf }
 0x377   :  { %634 = vmax.xlane.f32.xlu0 %v633_v63 }
 0x380   :  { %302 = vrot.lane.b32.xlu1 %v3279_v40, %s3129_s3 }
 0x384   :  { %378 = vrot.lane.b32.xlu1 %v3279_v40, %s3128_s2 }
 0x3fc   :  { %v293_v0 = vpop.xlane.xlu1 %292 }
 0x3fd   :  { %v294_v1 = vsub.f32 %v289_v55, %v293_v0  ;;  %v892_v55 = vld [vmem:[%s3673_s7] sm:$0xff] }
 0x3fe   :  { %v2950_v57 = vpack.c.bf16 %v893_v56, %v892_v55  ;;  %v1143_v55 = vld [vmem:[%s3679_s13 + $0x18] sm:$0xff] }
 0x3ff   :  { %v295_v2 = vmul.f32 1.442695, %v294_v1 }
 0x400   :  { %v303_v3 = vpop.permute.xlu1 %302 }
 0x401   :  { %3042 = vpow2.f32 %v295_v2  ;;  %2764 = vmatpush3.msra.mxu1 %v303_v3 }
 0x402   :  { %2768 = vmatprep.subr.mxu1 %v3124_v36 }
 0x404   :  { %v379_v6 = vpop.permute.xlu1 %378  ;;  %v635_v12 = vpop.xlane.xlu0 %634 }
 0x405   :  { %v636_v13 = vsub.f32 %v632_v62, %v635_v12 }
 0x407   :  { %v637_v17 = vmul.f32 1.442695, %v636_v13 }
 0x40b   :  { %v3043_v4 = vpop.eup %3042 }
 0x40c   :  { %v297_v5 = vsel %vm290_vm3, %v3043_v4, 0.0 }
 0x40d   :  { %298 = vadd.xlane.f32.xlu1 %v297_v5 }
 0x41e   :  { %722 = vrot.lane.b32.xlu1 %v3285_v41, %s3127_s22 }
 0x49a   :  { %v299_v7 = vpop.xlane.xlu1 %298 }
 0x49b   :  { %3044 = vrcp.f32 %v299_v7 }
 0x49c   :  { %3046 = vpow2.f32 %v637_v17 }
 0x49e   :  { %v723_v8 = vpop.permute.xlu1 %722 }
 0x49f   :  { %2789 = vmatpush3.xpose.msk.msra.mxu0 %vm209_vm2, %v723_v8  ;;  %v2582_v8 = vld [vmem:[%s3674_s8] ss:$0 sm:$0xff] }
 0x4a0   :  { %2951 = vmatprep.subr.bf16.mxu0 %v2950_v57 }
 0x4a2   :  { %2791 = vmatmul.mubr.msk.f32.vlgmr.msra.gmra.mrb[4].mxu0 %vm209_vm2, %v721_v9 }
 0x4a3   :  { %2953 = vmatpush3.bf16.msra.mxu0 %v2950_v57  ;;  %v1144_v57 = vld [vmem:[%s3679_s13 + $0x20] sm:$0xff] }
 0x4a4   :  { %2955 = vmatprep.subr.bf16.mxu0 %v2954_v61  ;;  %v2974_v60 = vpack.c.bf16 %v1145_v59, %v1144_v57  ;;  %v2593_v57 = vld [vmem:[%s3681_s15] ss:$0 sm:$0xff] }
 0x4a5   :  { %v3045_v10 = vpop.eup %3044 }
 0x4a6   :  { %v301_v11 = vmul.f32 %v3045_v10, %v3043_v4  ;;  %v3047_v27 = vpop.eup %3046 }
 0x4a7   :  { %v639_v28 = vsel %vm290_vm3, %v3047_v27, 0.0  ;;  %2957 = vmatpush3.bf16.msra.mxu0 %v2954_v61  ;;  %v1146_v61 = vld [vmem:[%s3679_s13 + $0x30] sm:$0xff] }
 0x4a8   :  { %2766 = vmatmul.mubr.msk.f32.vlgmr.msra.gmra.mrb[2].mxu1 %vm290_vm3, %v301_v11 }
 0x4a9   :  { %2769 = vmatpush3.xpose.msk.msra.mxu1 %vm209_vm2, %v381_v43  ;;  %2770 = vmatprep.mubr.msk.f32.mxu1 %vm3125_vm1, %v3124_v36 }
 0x4aa   :  { %2773 = vmatprep.subr.mxu1 %v3124_v36 }
 0x4ac   :  { %2771 = vmatmul.mubr.msk.f32.vlgmr.msra.gmra.mrb[4].mxu1 %vm209_vm2, %v379_v6 }
 0x4ad   :  { %2775 = vmatprep.mubr.msk.f32.mxu1 %vm3125_vm1, %v3124_v36 }
 0x575   :  { %v794_v14 = vpop.f32.mrb[4].mxu0 }
 0x576   :  { %v798_v15 = vmul.f32 0.25, %v794_v14  ;;  %v2792_v16 = vpop.f32.mrb[5].mxu0 }
 0x578   :  { %v799_v18 = vadd.f32 %v798_v15, %v3310_v58 }
 0x57a   :  { %v800_v19 = vsel %vm290_vm3, %v799_v18, -inf }
 0x57b   :  { %v3334_v20 = vpop.f32.mrb[2].mxu1  ;;  %801 = vmax.xlane.f32.xlu0 %v800_v19 }
 0x57c   :  { %v2767_v21 = vpop.f32.mrb[3].mxu1 }
 0x57f   :  { %v452_v22 = vpop.f32.mrb[4].mxu1 }
 0x580   :  { %v456_v23 = vmul.f32 0.25, %v452_v22  ;;  %v2772_v24 = vpop.f32.mrb[5].mxu1 }
 0x582   :  { %v457_v25 = vadd.f32 %v456_v23, %v3306_v51 }
 0x584   :  { %v458_v26 = vsel %vm290_vm3, %v457_v25, -inf }
 0x585   :  { %459 = vmax.xlane.f32.xlu1 %v458_v26  ;;  %v1031_v26 = vld [vmem:[%s3677_s11 + $0x8] sm:$0xff] }
 0x589   :  { %640 = vadd.xlane.f32.xlu1 %v639_v28  ;;  %v1032_v28 = vld [vmem:[%s3677_s11 + $0x10] sm:$0xff] }
 0x59a   :  { %469 = vrot.lane.b32.xlu1 %v3279_v40, %s3130_s26 }
 0x59e   :  { %811 = vrot.lane.b32.xlu1 %v3285_v41, %s3130_s26 }
 0x608   :  { %v802_v29 = vpop.xlane.xlu0 %801 }
 0x609   :  { %v803_v30 = vsub.f32 %v799_v18, %v802_v29  ;;  %v1033_v29 = vld [vmem:[%s3677_s11 + $0x18] sm:$0xff] }
 0x60b   :  { %v804_v31 = vmul.f32 1.442695, %v803_v30  ;;  %v2962_v30 = vpack.c.bf16 %v1033_v29, %v1032_v28 }
 0x60d   :  { %3048 = vpow2.f32 %v804_v31 }
 0x612   :  { %v460_v32 = vpop.xlane.xlu1 %459 }
 0x613   :  { %v461_v34 = vsub.f32 %v457_v25, %v460_v32 }
 0x615   :  { %v462_v37 = vmul.f32 1.442695, %v461_v34 }
 0x616   :  { %v641_v38 = vpop.xlane.xlu1 %640 }
 0x617   :  { %v3049_v39 = vpop.eup %3048  ;;  %3050 = vpow2.f32 %v462_v37 }
 0x618   :  { %v806_v42 = vsel %vm290_vm3, %v3049_v39, 0.0 }
 0x619   :  { %807 = vadd.xlane.f32.xlu0 %v806_v42 }
 0x61a   :  { %v470_v43 = vpop.permute.xlu1 %469 }
 0x61b   :  { %2774 = vmatpush3.msra.mxu1 %v470_v43  ;;  %v2585_v43 = vld [vmem:[%s3675_s9] ss:$0 sm:$0xff] }
 0x61c   :  { %2783 = vmatprep.subr.mxu1 %v3124_v36 }
 0x621   :  { %v3051_v40 = vpop.eup %3050 }
 0x622   :  { %v464_v44 = vsel %vm290_vm3, %v3051_v40, 0.0 }
 0x623   :  { %465 = vadd.xlane.f32.xlu0 %v464_v44  ;;  %v2586_v44 = vld [vmem:[%s3676_s10] ss:$0 sm:$0xff] }
 0x639   :  { %644 = vrot.lane.b32.xlu0 %v3285_v41, %s3129_s3  ;;  %v812_v41 = vpop.permute.xlu1 %811 }
 0x6a6   :  { %v808_v45 = vpop.xlane.xlu0 %807 }
 0x6b0   :  { %v466_v46 = vpop.xlane.xlu0 %465 }
 0x6b1   :  { %3052 = vrcp.f32 %v466_v46 }
 0x6b2   :  { %3054 = vrcp.f32 %v641_v38 }
 0x6b3   :  { %3056 = vrcp.f32 %v808_v45 }
 0x6b4   :  { %v645_v50 = vpop.permute.xlu0 %644 }
 0x6bb   :  { %v3053_v47 = vpop.eup %3052 }
 0x6bc   :  { %v468_v48 = vmul.f32 %v3053_v47, %v3051_v40  ;;  %v3055_v49 = vpop.eup %3054 }
 0x6bd   :  { %v643_v52 = vmul.f32 %v3055_v49, %v3047_v27  ;;  %v3057_v53 = vpop.eup %3056 }
 0x6be   :  { %2776 = vmatmul.mubr.msk.f32.vlgmr.msra.gmra.mrb[6].mxu1 %vm290_vm3, %v468_v48  ;;  %v810_v54 = vmul.f32 %v3057_v53, %v3049_v39  ;;  %v1141_v53 = vld [vmem:[%s3679_s13 + $0x8] sm:$0xff] }
 0x6bf   :  { %2784 = vmatpush3.msra.mxu1 %v645_v50  ;;  %2785 = vmatprep.mubr.msk.f32.mxu1 %vm3125_vm1, %v3124_v36 }
 0x6c0   :  { %2793 = vmatprep.subr.mxu1 %v3124_v36 }
 0x6c2   :  { %2786 = vmatmul.mubr.msk.f32.vlgmr.msra.gmra.mrb[8].mxu1 %vm290_vm3, %v643_v52  ;;  %v1140_v52 = vld [vmem:[%s3679_s13] sm:$0xff] }
 0x6c3   :  { %2794 = vmatpush3.msra.mxu1 %v812_v41  ;;  %2795 = vmatprep.mubr.msk.f32.mxu1 %vm3125_vm1, %v3124_v36  ;;  %v2966_v41 = vpack.c.bf16 %v1141_v53, %v1140_v52 }
 0x6c5   :  { %2967 = vmatprep.subr.bf16.mxu0 %v2966_v41 }
 0x6c6   :  { %2796 = vmatmul.mubr.msk.f32.vlgmr.msra.gmra.mrb[10].mxu1 %vm290_vm3, %v810_v54  ;;  %v1142_v54 = vld [vmem:[%s3679_s13 + $0x10] sm:$0xff] }
 0x6c7   :  { %v2970_v56 = vpack.c.bf16 %v1143_v55, %v1142_v54 }
 0x791   :  { %v541_v62 = vpop.f32.mrb[6].mxu1 }
 0x792   :  { %546 = vrot.lane.b32.xlu1 %v541_v62, %s3131_s23  ;;  %v2777_v63 = vpop.f32.mrb[7].mxu1  ;;  %v1147_v62 = vld [vmem:[%s3679_s13 + $0x38] sm:$0xff] }
 0x793   :  { %v2978_v63 = vpack.c.bf16 %v1147_v62, %v1146_v61  ;;  %v2594_v62 = vld [vmem:[%s3682_s16] ss:$0 sm:$0xff] }
 0x795   :  { %v716_v0 = vpop.f32.mrb[8].mxu1 }
 0x796   :  { %v2787_v1 = vpop.f32.mrb[9].mxu1 }
 0x799   :  { %v883_v2 = vpop.f32.mrb[10].mxu1 }
 0x79a   :  { %888 = vrot.lane.b32.xlu1 %v883_v2, %s3131_s23  ;;  %v2797_v3 = vpop.f32.mrb[11].mxu1 }
 0x804   :  { %v547_v4 = vpop.permute.xlu1 %546 }
 0x805   :  { %v549_v5 = vsel %vm209_vm2, %v3334_v20, %v547_v4 }
 0x806   :  { %2806 = vmatprep.mubr.msk.f32.mxu0 %vm67_vm0, %v549_v5 }
 0x80c   :  { %v889_v6 = vpop.permute.xlu1 %888 }
 0x80d   :  { %v891_v7 = vsel %vm209_vm2, %v716_v0, %v889_v6  ;;  %v2587_v0 = vld [vmem:[%s3678_s12] ss:$0 sm:$0xff] }
 0x80e   :  { %2807 = vmatmul.mubr.msk.f32.vlgmr.msra.gmra.mrb[6].mxu0 %vm67_vm0, %v891_v7 }
 0x80f   :  { %2969 = vmatpush3.bf16.msra.mxu0 %v2966_v41 }
 0x810   :  { %2971 = vmatprep.subr.bf16.mxu0 %v2970_v56 }
 0x813   :  { %2973 = vmatpush3.bf16.msra.mxu0 %v2970_v56 }
 0x814   :  { %2975 = vmatprep.subr.bf16.mxu0 %v2974_v60 }
 0x817   :  { %2977 = vmatpush3.bf16.msra.mxu0 %v2974_v60 }
 0x818   :  { %2979 = vmatprep.subr.bf16.mxu0 %v2978_v63 }
 0x81b   :  { %2981 = vmatpush3.bf16.msra.mxu0 %v2978_v63 }
 0x81c   :  { %2860 = vmatprep.subr.mxu0 %v3124_v36 }
 0x8e1   :  { %v2808_v9 = vpop.f32.mrb[6].mxu0 }
 0x8e2   :  { %v981_v10 = vadd.f32 %v2808_v9, %v2582_v8  ;;  %v975_v11 = vpop.f32.mrb[7].mxu0 }
 0x8e3   :  { %v976_v12 = vadd.f32 %v2582_v8, %v975_v11 }
 0x8e4   :  { %v985_v13 = vadd.f32 %v981_v10, %v3266_v35 }
 0x8e5   :  { %v984_v14 = vadd.f32 %v976_v12, %v3262_v33  ;;  %v1030_v33 = vld [vmem:[%s3677_s11] sm:$0xff] }
 0x8e6   :  { %v991_v15 = vsel %vm67_vm0, %v985_v13, 0.0  ;;  %v2958_v27 = vpack.c.bf16 %v1031_v26, %v1030_v33 }
 0x8e7   :  { %992 = vadd.xlane.f32.xlu1 %v991_v15  ;;  %v988_v16 = vsel %vm67_vm0, %v984_v14, 0.0 }
 0x8e8   :  { %989 = vadd.xlane.f32.xlu0 %v988_v16  ;;  %2959 = vmatprep.subr.bf16.mxu1 %v2958_v27 }
 0x8e9   :  { %2961 = vmatpush3.bf16.msra.mxu1 %v2958_v27 }
 0x8ea   :  { %2963 = vmatprep.subr.bf16.mxu1 %v2962_v30 }
 0x8ed   :  { %2965 = vmatpush3.bf16.msra.mxu1 %v2962_v30 }
 0x974   :  { %v993_v17 = vpop.xlane.xlu1 %992 }
 0x975   :  { %v995_v18 = vmul.f32 0.03125, %v993_v17  ;;  %v990_v19 = vpop.xlane.xlu0 %989 }
 0x976   :  { %v994_v20 = vmul.f32 0.03125, %v990_v19 }
 0x977   :  { %v997_v21 = vsub.f32 %v985_v13, %v995_v18 }
 0x978   :  { %v996_v22 = vsub.f32 %v984_v14, %v994_v20 }
 0x979   :  { %v999_v25 = vmul.f32 %v997_v21, %v997_v21 }
 0x97a   :  { %v998_v23 = vmul.f32 %v996_v22, %v996_v22 }
 0x97b   :  { %v1003_v35 = vsel %vm67_vm0, %v999_v25, 0.0 }
 0x97c   :  { %v1000_v24 = vsel %vm67_vm0, %v998_v23, 0.0  ;;  %v2590_v23 = vld [vmem:[%s3680_s14] ss:$0 sm:$0xff] }
 0x97d   :  { %1001 = vadd.xlane.f32.xlu0 %v1000_v24 }
 0x981   :  { %1004 = vadd.xlane.f32.xlu0 %v1003_v35 }
 0xa0a   :  { %v1002_v31 = vpop.xlane.xlu0 %1001 }
 0xa0b   :  { %v1006_v32 = vmul.f32 0.03125, %v1002_v31 }
 0xa0d   :  { %v1008_v34 = vadd.f32 1e-12, %v1006_v32 }
 0xa0e   :  { %v1005_v37 = vpop.xlane.xlu0 %1004 }
 0xa0f   :  { %3058 = vrsqrt.f32 %v1008_v34  ;;  %v1007_v38 = vmul.f32 0.03125, %v1005_v37 }
 0xa11   :  { %v1009_v39 = vadd.f32 1e-12, %v1007_v38 }
 0xa13   :  { %3060 = vrsqrt.f32 %v1009_v39 }
 0xa19   :  { %v3059_v42 = vpop.eup %3058 }
 0xa1a   :  { %v1012_v40 = vmul.f32 %v3059_v42, %v996_v22 }
 0xa1c   :  { %v1020_v45 = vmul.f32 %v2585_v43, %v1012_v40 }
 0xa1d   :  { %v3061_v46 = vpop.eup %3060 }
 0xa1e   :  { %v1013_v47 = vmul.f32 %v3061_v46, %v997_v21  ;;  %v1028_v48 = vadd.f32 %v2586_v44, %v1020_v45  ;;  %v2596_v45 = vld [vmem:[%s3671_s5 + $0x28] sm:$0xff] }
 0xa20   :  { %v1021_v49 = vmul.f32 %v2585_v43, %v1013_v47  ;;  %2817 = vmatprep.mubr.msk.f32.mxu1 %vm67_vm0, %v1028_v48  ;;  %v2597_v47 = vld [vmem:[%s3671_s5 + $0x30] sm:$0xff] }
 0xa22   :  { %v1029_v50 = vadd.f32 %v2586_v44, %v1021_v49  ;;  %v2595_v44 = vld [vmem:[%s3671_s5 + $0x20] sm:$0xff] }
 0xa23   :  { %v2982_v46 = vpack.c.bf16 %v2596_v45, %v2595_v44 }
 0xa24   :  { %2818 = vmatmul.mubr.msk.f32.vlgmr.msra.gmra.mrb[12].mxu1 %vm67_vm0, %v1029_v50 }
 0xa25   :  { %2983 = vmatprep.subr.bf16.mxu1 %v2982_v46 }
 0xa26   :  { %2985 = vmatpush3.bf16.msra.mxu1 %v2982_v46 }
 0xaf7   :  { %v2819_v1 = vpop.f32.mrb[12].mxu1 }
 0xaf8   :  { %v1119_v2 = vadd.f32 %v2819_v1, %v2587_v0  ;;  %v1113_v3 = vpop.f32.mrb[13].mxu1 }
 0xaf9   :  { %v1114_v4 = vadd.f32 %v2587_v0, %v1113_v3  ;;  %v2600_v3 = vld [vmem:[%s3672_s6 + $0x1] ss:$0 sm:$0xff] }
 0xafa   :  { %v1125_v5 = vmul.f32 0.044715, %v1119_v2  ;;  %v1123_v20 = vmul.f32 0.5, %v1119_v2 }
 0xafb   :  { %v1124_v6 = vmul.f32 0.044715, %v1114_v4  ;;  %v1122_v18 = vmul.f32 0.5, %v1114_v4 }
 0xafc   :  { %v1127_v7 = vmul.f32 %v1125_v5, %v1119_v2 }
 0xafd   :  { %v1126_v8 = vmul.f32 %v1124_v6, %v1114_v4 }
 0xafe   :  { %v1129_v9 = vmul.f32 %v1127_v7, %v1119_v2 }
 0xaff   :  { %v1128_v10 = vmul.f32 %v1126_v8, %v1114_v4 }
 0xb00   :  { %v1131_v11 = vadd.f32 %v1129_v9, %v1119_v2 }
 0xb01   :  { %v1130_v12 = vadd.f32 %v1128_v10, %v1114_v4 }
 0xb02   :  { %v1133_v13 = vmul.f32 0.7978846, %v1131_v11 }
 0xb03   :  { %v1132_v14 = vmul.f32 0.7978846, %v1130_v12 }
 0xb04   :  { %3062 = vtanh.f32 %v1133_v13 }
 0xb05   :  { %3064 = vtanh.f32 %v1132_v14 }
 0xb0e   :  { %v3063_v15 = vpop.eup %3062 }
 0xb0f   :  { %v3065_v16 = vpop.eup %3064  ;;  %v1137_v17 = vadd.f32 1.0, %v3063_v15 }
 0xb10   :  { %v1136_v19 = vadd.f32 1.0, %v3065_v16 }
 0xb11   :  { %v1139_v22 = vmul.f32 %v1137_v17, %v1123_v20 }
 0xb12   :  { %v1138_v21 = vmul.f32 %v1136_v19, %v1122_v18 }
 0xb14   :  { %2836 = vmatprep.mubr.msk.f32.mxu0 %vm1155_vm4, %v1138_v21 }
 0xb15   :  { %2837 = vmatmul.mubr.msk.f32.vlgmr.msra.gmra.mrb[8].mxu0 %vm1155_vm4, %v1139_v22 }
 0xb16   :  { %2862 = vmatprep.mubr.msk.f32.mxu0 %vm3125_vm1, %v3124_v36 }
 0xbe8   :  { %v2838_v24 = vpop.f32.mrb[8].mxu0 }
 0xbe9   :  { %v1234_v25 = vadd.f32 %v2838_v24, %v2590_v23  ;;  %v1228_v35 = vpop.f32.mrb[9].mxu0 }
 0xbea   :  { %v1229_v33 = vadd.f32 %v2590_v23, %v1228_v35 }
 0xbeb   :  { %v1238_v26 = vadd.f32 %v1234_v25, %v1029_v50 }
 0xbec   :  { %v1237_v27 = vadd.f32 %v1229_v33, %v1028_v48  ;;  %v2598_v48 = vld [vmem:[%s3671_s5 + $0x38] sm:$0xff] }
 0xbed   :  { %v1244_v28 = vsel %vm67_vm0, %v1238_v26, 0.0  ;;  %v2986_v49 = vpack.c.bf16 %v2598_v48, %v2597_v47 }
 0xbee   :  { %1245 = vadd.xlane.f32.xlu1 %v1244_v28  ;;  %v1241_v29 = vsel %vm67_vm0, %v1237_v27, 0.0 }
 0xbef   :  { %1242 = vadd.xlane.f32.xlu0 %v1241_v29  ;;  %2987 = vmatprep.subr.bf16.mxu1 %v2986_v49 }
 0xbf0   :  { %2989 = vmatpush3.bf16.msra.mxu1 %v2986_v49 }
 0xbf1   :  { %2850 = vmatprep.subr.mxu1 %v3124_v36 }
 0xc7b   :  { %v1246_v30 = vpop.xlane.xlu1 %1245 }
 0xc7c   :  { %v1248_v31 = vmul.f32 0.03125, %v1246_v30  ;;  %v1243_v32 = vpop.xlane.xlu0 %1242 }
 0xc7d   :  { %v1247_v34 = vmul.f32 0.03125, %v1243_v32 }
 0xc7e   :  { %v1250_v37 = vsub.f32 %v1238_v26, %v1248_v31 }
 0xc7f   :  { %v1249_v38 = vsub.f32 %v1237_v27, %v1247_v34 }
 0xc80   :  { %v1252_v39 = vmul.f32 %v1250_v37, %v1250_v37 }
 0xc81   :  { %v1251_v42 = vmul.f32 %v1249_v38, %v1249_v38 }
 0xc82   :  { %v1256_v43 = vsel %vm67_vm0, %v1252_v39, 0.0 }
 0xc83   :  { %1257 = vadd.xlane.f32.xlu1 %v1256_v43  ;;  %v1253_v40 = vsel %vm67_vm0, %v1251_v42, 0.0 }
 0xc84   :  { %1254 = vadd.xlane.f32.xlu0 %v1253_v40 }
 0xd10   :  { %v1258_v50 = vpop.xlane.xlu1 %1257 }
 0xd11   :  { %v1260_v52 = vmul.f32 0.03125, %v1258_v50  ;;  %v1255_v53 = vpop.xlane.xlu0 %1254 }
 0xd12   :  { %v1259_v41 = vmul.f32 0.03125, %v1255_v53 }
 0xd13   :  { %v1262_v54 = vadd.f32 1e-12, %v1260_v52 }
 0xd14   :  { %v1261_v55 = vadd.f32 1e-12, %v1259_v41 }
 0xd15   :  { %3066 = vrsqrt.f32 %v1262_v54 }
 0xd16   :  { %3068 = vrsqrt.f32 %v1261_v55 }
 0xd1f   :  { %v3067_v56 = vpop.eup %3066 }
 0xd20   :  { %v3069_v59 = vpop.eup %3068  ;;  %v1266_v60 = vmul.f32 %v3067_v56, %v1250_v37 }
 0xd21   :  { %v1265_v61 = vmul.f32 %v3069_v59, %v1249_v38 }
 0xd22   :  { %v1274_v63 = vmul.f32 %v2593_v57, %v1266_v60 }
 0xd23   :  { %v1273_v0 = vmul.f32 %v2593_v57, %v1265_v61 }
 0xd24   :  { %v3464_v2 = vadd.f32 %v2594_v62, %v1274_v63 }
 0xd25   :  { %v3462_v1 = vadd.f32 %v2594_v62, %v1273_v0 }
 0xd27   :  { %2847 = vmatprep.mubr.msk.f32.mxu1 %vm67_vm0, %v3462_v1 }
 0xd28   :  { %2848 = vmatmul.mubr.msk.f32.vlgmr.msra.gmra.mrb[14].mxu1 %vm67_vm0, %v3464_v2 }
 0xd29   :  { %2852 = vmatprep.mubr.msk.f32.mxu1 %vm3125_vm1, %v3124_v36 }
 0xdfb   :  { %v2849_v4 = vpop.f32.mrb[14].mxu1 }
 0xdfc   :  { %v1368_v5 = vpop.f32.mrb[15].mxu1  ;;  %v3481_v7 = vadd.f32 %v2849_v4, %v2600_v3 }
 0xdfd   :  { %v3475_v6 = vadd.f32 %v2600_v3, %v1368_v5 }
 0xdff   :  { %1545 = vrot.lane.b32.xlu1 %v3475_v6, %s3127_s22  ;;  %1378 = vrot.lane.b32.xlu0 %v3475_v6, %s3126_s1 }
 0xe03   :  { %1543 = vrot.lane.b32.xlu1 %v3475_v6, %s3128_s2  ;;  %1883 = vrot.lane.b32.xlu0 %v3481_v7, %s3127_s22 }
 0xe07   :  { %1716 = vrot.lane.b32.xlu1 %v3481_v7, %s3126_s1 }
 0xe0b   :  { %1881 = vrot.lane.b32.xlu1 %v3481_v7, %s3128_s2 }
 0xe71   :  { %v1546_v8 = vpop.permute.xlu1 %1545  ;;  %v1379_v9 = vpop.permute.xlu0 %1378 }
 0xe72   :  { %2851 = vmatpush3.xpose.msk.msra.mxu1 %vm209_vm2, %v1379_v9  ;;  %2861 = vmatpush3.xpose.msk.msra.mxu0 %vm209_vm2, %v1546_v8  ;;  %v2615_v9 = vld [vmem:[%s3673_s7 + $0x20] sm:$0xff] }
 0xe73   :  { %2870 = vmatprep.subr.mxu0 %v3124_v36  ;;  %2855 = vmatprep.subr.mxu1 %v3124_v36 }
 0xe75   :  { %v1544_v10 = vpop.permute.xlu1 %1543  ;;  %2853 = vmatmul.mubr.msk.f32.vlgmr.msra.gmra.mrb[16].mxu1 %vm209_vm2, %v3475_v6  ;;  %v1884_v12 = vpop.permute.xlu0 %1883 }
 0xe76   :  { %2863 = vmatmul.mubr.msk.f32.vlgmr.msra.gmra.mrb[10].mxu0 %vm209_vm2, %v1544_v10  ;;  %2857 = vmatprep.mubr.msk.f32.mxu1 %vm3125_vm1, %v3124_v36  ;;  %v2616_v10 = vld [vmem:[%s3673_s7 + $0x28] sm:$0xff] }
 0xe77   :  { %2872 = vmatprep.mubr.msk.f32.mxu0 %vm3125_vm1, %v3124_v36 }
 0xe79   :  { %v1717_v11 = vpop.permute.xlu1 %1716 }
 0xe7a   :  { %2871 = vmatpush3.xpose.msk.msra.mxu0 %vm209_vm2, %v1717_v11  ;;  %v2617_v11 = vld [vmem:[%s3673_s7 + $0x30] sm:$0xff] }
 0xe7b   :  { %2880 = vmatprep.subr.mxu0 %v3124_v36 }
 0xe7d   :  { %2873 = vmatmul.mubr.msk.f32.vlgmr.msra.gmra.mrb[12].mxu0 %vm209_vm2, %v3481_v7  ;;  %v1882_v13 = vpop.permute.xlu1 %1881 }
 0xe7e   :  { %2881 = vmatpush3.xpose.msk.msra.mxu0 %vm209_vm2, %v1884_v12  ;;  %2882 = vmatprep.mubr.msk.f32.mxu0 %vm3125_vm1, %v3124_v36  ;;  %v2990_v12 = vpack.c.bf16 %v2616_v10, %v2615_v9  ;;  %v2638_v9 = vld [vmem:[%s3679_s13 + $0x58] sm:$0xff] }
 0xe80   :  { %2991 = vmatprep.subr.bf16.mxu0 %v2990_v12 }
 0xe81   :  { %2883 = vmatmul.mubr.msk.f32.vlgmr.msra.gmra.mrb[14].mxu0 %vm209_vm2, %v1882_v13  ;;  %v2618_v13 = vld [vmem:[%s3673_s7 + $0x38] sm:$0xff]  ;;  %s2557_s7 = sshll.u32 %s3133_s4, 4  ;;  %s2558_s7 = int_to_ptr.vmem [resolvable:$true] %s2557_s7 }
 0xe82   :  { %2993 = vmatpush3.bf16.msra.mxu0 %v2990_v12  ;;  %v2640_v12 = vld [vmem:[%s3679_s13 + $0x68] sm:$0xff]  ;;  %p3105_p1 = scmp.lt.s32.totalorder %s2558_s7, %s2558_s7 }
 0xf48   :  { %v1450_v14 = vpop.f32.mrb[16].mxu1 }
 0xf49   :  { %v1454_v15 = vmul.f32 0.25, %v1450_v14  ;;  %v2854_v16 = vpop.f32.mrb[17].mxu1  ;;  %v1617_v17 = vpop.f32.mrb[10].mxu0  ;;  %v2994_v14 = vpack.c.bf16 %v2618_v13, %v2617_v11  ;;  %v2639_v11 = vld [vmem:[%s3679_s13 + $0x60] sm:$0xff] }
 0xf4a   :  { %v1621_v18 = vmul.f32 0.25, %v1617_v17  ;;  %v2864_v19 = vpop.f32.mrb[11].mxu0  ;;  %v3014_v13 = vpack.c.bf16 %v2640_v12, %v2639_v11 }
 0xf4b   :  { %v1455_v20 = vadd.f32 %v1454_v15, %v3306_v51  ;;  %2995 = vmatprep.subr.bf16.mxu0 %v2994_v14 }
 0xf4c   :  { %v1622_v21 = vadd.f32 %v1621_v18, %v3306_v51  ;;  %2997 = vmatpush3.bf16.msra.mxu0 %v2994_v14  ;;  %v2641_v14 = vld [vmem:[%s3679_s13 + $0x70] sm:$0xff] }
 0xf4d   :  { %v1456_v22 = vsel %vm290_vm3, %v1455_v20, -inf }
 0xf4e   :  { %1457 = vmax.xlane.f32.xlu0 %v1456_v22  ;;  %v1623_v23 = vsel %vm290_vm3, %v1622_v21, -inf }
 0xf4f   :  { %1624 = vmax.xlane.f32.xlu1 %v1623_v23 }
 0xf50   :  { %v1788_v24 = vpop.f32.mrb[12].mxu0 }
 0xf51   :  { %v1792_v25 = vmul.f32 0.25, %v1788_v24  ;;  %v2874_v35 = vpop.f32.mrb[13].mxu0 }
 0xf53   :  { %v1793_v33 = vadd.f32 %v1792_v25, %v3310_v58 }
 0xf54   :  { %v1955_v26 = vpop.f32.mrb[14].mxu0 }
 0xf55   :  { %v1959_v27 = vmul.f32 0.25, %v1955_v26  ;;  %v2884_v28 = vpop.f32.mrb[15].mxu0  ;;  %v1794_v29 = vsel %vm290_vm3, %v1793_v33, -inf }
 0xf56   :  { %1795 = vmax.xlane.f32.xlu0 %v1794_v29 }
 0xf57   :  { %v1960_v30 = vadd.f32 %v1959_v27, %v3310_v58 }
 0xf59   :  { %v1961_v51 = vsel %vm290_vm3, %v1960_v30, -inf }
 0xf5a   :  { %1962 = vmax.xlane.f32.xlu0 %v1961_v51 }
 0xfdb   :  { %v1458_v31 = vpop.xlane.xlu0 %1457 }
 0xfdc   :  { %v1459_v32 = vsub.f32 %v1455_v20, %v1458_v31  ;;  %v1625_v34 = vpop.xlane.xlu1 %1624 }
 0xfdd   :  { %v1626_v37 = vsub.f32 %v1622_v21, %v1625_v34 }
 0xfde   :  { %v1460_v38 = vmul.f32 1.442695, %v1459_v32 }
 0xfdf   :  { %v1627_v39 = vmul.f32 1.442695, %v1626_v37 }
 0xfe0   :  { %3070 = vpow2.f32 %v1460_v38 }
 0xfe1   :  { %3072 = vpow2.f32 %v1627_v39 }
 0xfe3   :  { %v1796_v42 = vpop.xlane.xlu0 %1795 }
 0xfe4   :  { %v1797_v43 = vsub.f32 %v1793_v33, %v1796_v42  ;;  %v2620_v33 = vld [vmem:[%s3674_s8 + $0x1] ss:$0 sm:$0xff] }
 0xfe6   :  { %v1798_v40 = vmul.f32 1.442695, %v1797_v43 }
 0xfe7   :  { %v1963_v49 = vpop.xlane.xlu0 %1962 }
 0xfe8   :  { %3074 = vpow2.f32 %v1798_v40  ;;  %v1964_v50 = vsub.f32 %v1960_v30, %v1963_v49 }
 0xfea   :  { %v3071_v44 = vpop.eup %3070  ;;  %v1965_v52 = vmul.f32 1.442695, %v1964_v50 }
 0xfeb   :  { %v3073_v45 = vpop.eup %3072  ;;  %v1462_v46 = vsel %vm290_vm3, %v3071_v44, 0.0 }
 0xfec   :  { %1463 = vadd.xlane.f32.xlu0 %v1462_v46  ;;  %v1629_v58 = vsel %vm290_vm3, %v3073_v45, 0.0  ;;  %3076 = vpow2.f32 %v1965_v52  ;;  %v2628_v46 = vld [vmem:[%s3677_s11 + $0x28] sm:$0xff] }
 0xfed   :  { %1630 = vadd.xlane.f32.xlu1 %v1629_v58 }
 0xff2   :  { %v3075_v47 = vpop.eup %3074 }
 0xff3   :  { %v1800_v48 = vsel %vm290_vm3, %v3075_v47, 0.0 }
 0xff4   :  { %1801 = vadd.xlane.f32.xlu0 %v1800_v48  ;;  %v2630_v48 = vld [vmem:[%s3677_s11 + $0x38] sm:$0xff] }
 0xff6   :  { %v3077_v53 = vpop.eup %3076 }
 0xff7   :  { %v1967_v41 = vsel %vm290_vm3, %v3077_v53, 0.0 }
 0xffe   :  { %1634 = vrot.lane.b32.xlu1 %v3475_v6, %s3130_s26 }
0x1002   :  { %1805 = vrot.lane.b32.xlu1 %v3481_v7, %s3129_s3 }
0x100a   :  { %1467 = vrot.lane.b32.xlu0 %v3475_v6, %s3129_s3 }
0x1026   :  { %1968 = vadd.xlane.f32.xlu1 %v1967_v41 }
0x1037   :  { %1972 = vrot.lane.b32.xlu1 %v3481_v7, %s3130_s26 }
0x1079   :  { %v1464_v54 = vpop.xlane.xlu0 %1463 }
0x107a   :  { %3078 = vrcp.f32 %v1464_v54  ;;  %v1631_v55 = vpop.xlane.xlu1 %1630 }
0x107b   :  { %3080 = vrcp.f32 %v1631_v55 }
0x107e   :  { %v1635_v60 = vpop.permute.xlu1 %1634 }
0x1081   :  { %v1802_v56 = vpop.xlane.xlu0 %1801 }
0x1082   :  { %3082 = vrcp.f32 %v1802_v56  ;;  %v1806_v0 = vpop.permute.xlu1 %1805 }
0x1084   :  { %v3079_v57 = vpop.eup %3078 }
0x1085   :  { %v1466_v59 = vmul.f32 %v3079_v57, %v3071_v44  ;;  %v1468_v61 = vpop.permute.xlu0 %1467  ;;  %v3081_v62 = vpop.eup %3080  ;;  %v2625_v57 = vld [vmem:[%s3675_s9 + $0x1] ss:$0 sm:$0xff] }
0x1086   :  { %2856 = vmatpush3.msra.mxu1 %v1468_v61  ;;  %v1633_v63 = vmul.f32 %v3081_v62, %v3073_v45 }
0x1087   :  { %2858 = vmatmul.mubr.msk.f32.vlgmr.msra.gmra.mrb[18].mxu1 %vm290_vm3, %v1466_v59  ;;  %2865 = vmatprep.subr.mxu1 %v3124_v36 }
0x1088   :  { %2866 = vmatpush3.msra.mxu1 %v1635_v60  ;;  %2867 = vmatprep.mubr.msk.f32.mxu1 %vm3125_vm1, %v3124_v36  ;;  %v2626_v60 = vld [vmem:[%s3676_s10 + $0x1] ss:$0 sm:$0xff] }
0x1089   :  { %2875 = vmatprep.subr.mxu1 %v3124_v36 }
0x108b   :  { %2868 = vmatmul.mubr.msk.f32.vlgmr.msra.gmra.mrb[20].mxu1 %vm290_vm3, %v1633_v63 }
0x108c   :  { %v3083_v3 = vpop.eup %3082  ;;  %2876 = vmatpush3.msra.mxu1 %v1806_v0  ;;  %2877 = vmatprep.mubr.msk.f32.mxu1 %vm3125_vm1, %v3124_v36 }
0x108d   :  { %v1804_v4 = vmul.f32 %v3083_v3, %v3075_v47  ;;  %2885 = vmatprep.subr.mxu1 %v3124_v36  ;;  %v2629_v47 = vld [vmem:[%s3677_s11 + $0x30] sm:$0xff] }
0x108e   :  { %v3002_v49 = vpack.c.bf16 %v2630_v48, %v2629_v47 }
0x108f   :  { %2878 = vmatmul.mubr.msk.f32.vlgmr.msra.gmra.mrb[22].mxu1 %vm290_vm3, %v1804_v4 }
0x1090   :  { %2887 = vmatprep.mubr.msk.f32.mxu1 %vm3125_vm1, %v3124_v36 }
0x10b3   :  { %v1969_v5 = vpop.xlane.xlu1 %1968 }
0x10b4   :  { %3084 = vrcp.f32 %v1969_v5  ;;  %v2635_v5 = vld [vmem:[%s3679_s13 + $0x40] sm:$0xff] }
0x10b7   :  { %v1973_v6 = vpop.permute.xlu1 %1972 }
0x10b8   :  { %2886 = vmatpush3.msra.mxu1 %v1973_v6  ;;  %v2636_v6 = vld [vmem:[%s3679_s13 + $0x48] sm:$0xff] }
0x10be   :  { %v3085_v7 = vpop.eup %3084 }
0x10bf   :  { %v1971_v8 = vmul.f32 %v3085_v7, %v3077_v53  ;;  %v3006_v7 = vpack.c.bf16 %v2636_v6, %v2635_v5 }
0x10c1   :  { %2888 = vmatmul.mubr.msk.f32.vlgmr.msra.gmra.mrb[24].mxu1 %vm290_vm3, %v1971_v8  ;;  %v2637_v8 = vld [vmem:[%s3679_s13 + $0x50] sm:$0xff]  ;;  %3007 = vmatprep.subr.bf16.mxu0 %v3006_v7 }
0x10c2   :  { %v3010_v10 = vpack.c.bf16 %v2638_v9, %v2637_v8 }
0x115a   :  { %v1539_v15 = vpop.f32.mrb[18].mxu1 }
0x115b   :  { %v2859_v16 = vpop.f32.mrb[19].mxu1 }
0x115e   :  { %v1706_v17 = vpop.f32.mrb[20].mxu1 }
0x115f   :  { %1711 = vrot.lane.b32.xlu0 %v1706_v17, %s3131_s23  ;;  %v2869_v18 = vpop.f32.mrb[21].mxu1  ;;  %v2632_v17 = vld [vmem:[%s3678_s12 + $0x1] ss:$0 sm:$0xff] }
0x1162   :  { %v1877_v19 = vpop.f32.mrb[22].mxu1 }
0x1163   :  { %v2879_v20 = vpop.f32.mrb[23].mxu1 }
0x1194   :  { %v2044_v21 = vpop.f32.mrb[24].mxu1 }
0x1195   :  { %2049 = vrot.lane.b32.xlu1 %v2044_v21, %s3131_s23  ;;  %v2889_v22 = vpop.f32.mrb[25].mxu1 }
0x11d1   :  { %v1712_v23 = vpop.permute.xlu0 %1711 }
0x11d2   :  { %v1714_v24 = vsel %vm209_vm2, %v1539_v15, %v1712_v23  ;;  %v2642_v15 = vld [vmem:[%s3679_s13 + $0x78] sm:$0xff] }
0x11d3   :  { %2898 = vmatprep.mubr.msk.f32.mxu0 %vm67_vm0, %v1714_v24  ;;  %v3018_v16 = vpack.c.bf16 %v2642_v15, %v2641_v14  ;;  %v2650_v14 = vld [vmem:[%s3682_s16 + $0x1] ss:$0 sm:$0xff]  ;;  %s3694_s16 = sld [smem:[#allocation7_spill]] }
0x1207   :  { %v2050_v25 = vpop.permute.xlu1 %2049 }
0x1208   :  { %v2052_v35 = vsel %vm209_vm2, %v1877_v19, %v2050_v25 }
0x1209   :  { %2899 = vmatmul.mubr.msk.f32.vlgmr.msra.gmra.mrb[16].mxu0 %vm67_vm0, %v2052_v35 }
0x120a   :  { %3009 = vmatpush3.bf16.msra.mxu0 %v3006_v7 }
0x120b   :  { %3011 = vmatprep.subr.bf16.mxu0 %v3010_v10 }
0x120e   :  { %3013 = vmatpush3.bf16.msra.mxu0 %v3010_v10  ;;  %v2649_v10 = vld [vmem:[%s3681_s15 + $0x1] ss:$0 sm:$0xff] }
0x120f   :  { %3015 = vmatprep.subr.bf16.mxu0 %v3014_v13 }
0x1212   :  { %3017 = vmatpush3.bf16.msra.mxu0 %v3014_v13 }
0x1213   :  { %3019 = vmatprep.subr.bf16.mxu0 %v3018_v16 }
0x1216   :  { %3021 = vmatpush3.bf16.msra.mxu0 %v3018_v16 }
0x12dc   :  { %v2900_v26 = vpop.f32.mrb[16].mxu0 }
0x12dd   :  { %v2144_v27 = vadd.f32 %v2900_v26, %v2620_v33  ;;  %v2138_v28 = vpop.f32.mrb[17].mxu0 }
0x12de   :  { %v2139_v29 = vadd.f32 %v2620_v33, %v2138_v28 }
0x12df   :  { %v2148_v30 = vadd.f32 %v2144_v27, %v3464_v2 }
0x12e0   :  { %v2147_v51 = vadd.f32 %v2139_v29, %v3462_v1  ;;  %v2627_v1 = vld [vmem:[%s3677_s11 + $0x20] sm:$0xff] }
0x12e1   :  { %v2156_v31 = vsel %vm67_vm0, %v2148_v30, 0.0  ;;  %v2998_v58 = vpack.c.bf16 %v2628_v46, %v2627_v1 }
0x12e2   :  { %2157 = vadd.xlane.f32.xlu1 %v2156_v31  ;;  %v2153_v32 = vsel %vm67_vm0, %v2147_v51, 0.0 }
0x12e3   :  { %2154 = vadd.xlane.f32.xlu0 %v2153_v32  ;;  %2999 = vmatprep.subr.bf16.mxu1 %v2998_v58 }
0x12e4   :  { %3001 = vmatpush3.bf16.msra.mxu1 %v2998_v58 }
0x12e5   :  { %3003 = vmatprep.subr.bf16.mxu1 %v3002_v49 }
0x12e8   :  { %3005 = vmatpush3.bf16.msra.mxu1 %v3002_v49 }
0x136f   :  { %v2158_v34 = vpop.xlane.xlu1 %2157 }
0x1370   :  { %v2160_v37 = vmul.f32 0.03125, %v2158_v34  ;;  %v2155_v38 = vpop.xlane.xlu0 %2154 }
0x1371   :  { %v2159_v39 = vmul.f32 0.03125, %v2155_v38 }
0x1372   :  { %v2162_v42 = vsub.f32 %v2148_v30, %v2160_v37 }
0x1373   :  { %v2161_v43 = vsub.f32 %v2147_v51, %v2159_v39 }
0x1374   :  { %v2164_v45 = vmul.f32 %v2162_v42, %v2162_v42 }
0x1375   :  { %v2163_v40 = vmul.f32 %v2161_v43, %v2161_v43 }
0x1376   :  { %v2168_v2 = vsel %vm67_vm0, %v2164_v45, 0.0 }
0x1377   :  { %v2165_v44 = vsel %vm67_vm0, %v2163_v40, 0.0 }
0x1378   :  { %2166 = vadd.xlane.f32.xlu0 %v2165_v44 }
0x137c   :  { %2169 = vadd.xlane.f32.xlu0 %v2168_v2 }
0x1405   :  { %v2167_v50 = vpop.xlane.xlu0 %2166 }
0x1406   :  { %v2171_v52 = vmul.f32 0.03125, %v2167_v50 }
0x1408   :  { %v2173_v53 = vadd.f32 1e-12, %v2171_v52 }
0x1409   :  { %v2170_v41 = vpop.xlane.xlu0 %2169 }
0x140a   :  { %3086 = vrsqrt.f32 %v2173_v53  ;;  %v2172_v54 = vmul.f32 0.03125, %v2170_v41 }
0x140c   :  { %v2174_v55 = vadd.f32 1e-12, %v2172_v54 }
0x140e   :  { %3088 = vrsqrt.f32 %v2174_v55 }
0x1414   :  { %v3087_v56 = vpop.eup %3086 }
0x1415   :  { %v2177_v59 = vmul.f32 %v3087_v56, %v2161_v43 }
0x1417   :  { %v2185_v61 = vmul.f32 %v2625_v57, %v2177_v59  ;;  %v2459_v59 = vld [vmem:[%s3683_s17 + $0x8] sm:$0xff] }
0x1418   :  { %v3089_v62 = vpop.eup %3088 }
0x1419   :  { %v2178_v63 = vmul.f32 %v3089_v62, %v2162_v42  ;;  %v2193_v0 = vadd.f32 %v2626_v60, %v2185_v61  ;;  %v2644_v42 = vld [vmem:[%s3680_s14 + $0x1] ss:$0 sm:$0xff]  ;;  %v2460_v61 = vld [vmem:[%s3683_s17 + $0x10] sm:$0xff]  ;;  %v2461_v62 = vld [vmem:[%s3683_s17 + $0x18] sm:$0xff] }
0x141b   :  { %v2186_v3 = vmul.f32 %v2625_v57, %v2178_v63  ;;  %2909 = vmatprep.mubr.msk.f32.mxu1 %vm67_vm0, %v2193_v0  ;;  %v2458_v57 = vld [vmem:[%s3683_s17] sm:$0xff]  ;;  %v3132_v63 = vmov 0.0|0.0  }
0x141c   :  { %3022 = vmatprep.subr.bf16.mxu1 %v3132_v63 }
0x141d   :  { %v2194_v4 = vadd.f32 %v2626_v60, %v2186_v3  ;;  %v3023_v60 = vpack.c.bf16 %v2459_v59, %v2458_v57 }
0x141f   :  { %2910 = vmatmul.mubr.msk.f32.vlgmr.msra.gmra.mrb[26].mxu1 %vm67_vm0, %v2194_v4 }
0x1420   :  { %2939 = vmatprep.mubr.msk.f32.mxu1 %vm3125_vm1, %v3124_v36  ;;  %3024 = vmatpush3.bf16.msra.mxu1 %v3023_v60 }
0x1421   :  { %3025 = vmatprep.subr.bf16.mxu1 %v3132_v63 }
0x14f2   :  { %v2911_v18 = vpop.f32.mrb[26].mxu1 }
0x14f3   :  { %v2286_v19 = vadd.f32 %v2911_v18, %v2632_v17  ;;  %v2280_v20 = vpop.f32.mrb[27].mxu1 }
0x14f4   :  { %v2281_v21 = vadd.f32 %v2632_v17, %v2280_v20 }
0x14f5   :  { %v2292_v22 = vmul.f32 0.044715, %v2286_v19  ;;  %v2290_v37 = vmul.f32 0.5, %v2286_v19 }
0x14f6   :  { %v2291_v23 = vmul.f32 0.044715, %v2281_v21  ;;  %v2289_v32 = vmul.f32 0.5, %v2281_v21 }
0x14f7   :  { %v2294_v24 = vmul.f32 %v2292_v22, %v2286_v19 }
0x14f8   :  { %v2293_v25 = vmul.f32 %v2291_v23, %v2281_v21 }
0x14f9   :  { %v2296_v35 = vmul.f32 %v2294_v24, %v2286_v19 }
0x14fa   :  { %v2295_v33 = vmul.f32 %v2293_v25, %v2281_v21  ;;  %v2543_v25 = vld [vmem:[%s3694_s16] sm:$0x3] }
0x14fb   :  { %v2298_v26 = vadd.f32 %v2296_v35, %v2286_v19  ;;  %vm2544_vm6 = vcmp.ge.f32.partialorder %v2543_v25, 0.1 }
0x14fc   :  { %v2297_v27 = vadd.f32 %v2295_v33, %v2281_v21  ;;  %v2651_v21 = vld [vmem:[%s3684_s18] ss:$0 sm:$0xff]  ;;  %v2653_v35 = vsel %vm2544_vm6, 1.0, %v3124_v36  ;;  %s3100_s18 = scalar_lea.vmem %s2558_s7, 32 }
0x14fd   :  { %v2300_v28 = vmul.f32 0.7978846, %v2298_v26  ;;  %p3101_p0 = scmp.ne.s32.totalorder %s2558_s7, %s3100_s18  ;;  %p3106_p2 = scmp.lt.s32.totalorder %s3100_s18, %s3100_s18 }
0x14fe   :  { %v2299_v29 = vmul.f32 0.7978846, %v2297_v27 }
0x14ff   :  { %3090 = vtanh.f32 %v2300_v28  ;;  %p3107_p3 = por %p3106_p2, %p3105_p1 }
0x1500   :  { %3092 = vtanh.f32 %v2299_v29 }
0x1501   :  { %p3108_p4 = pnand %p3107_p3, %p3101_p0 }
0x1509   :  { %v3091_v30 = vpop.eup %3090 }
0x150a   :  { %v3093_v51 = vpop.eup %3092  ;;  %v2304_v31 = vadd.f32 1.0, %v3091_v30 }
0x150b   :  { %v2303_v34 = vadd.f32 1.0, %v3093_v51 }
0x150c   :  { %v2306_v39 = vmul.f32 %v2304_v31, %v2290_v37 }
0x150d   :  { %v2305_v38 = vmul.f32 %v2303_v34, %v2289_v32 }
0x150f   :  { %2928 = vmatprep.mubr.msk.f32.mxu0 %vm1155_vm4, %v2305_v38 }
0x1510   :  { %2929 = vmatmul.mubr.msk.f32.vlgmr.msra.gmra.mrb[18].mxu0 %vm1155_vm4, %v2306_v39 }
0x15e3   :  { %v2930_v43 = vpop.f32.mrb[18].mxu0 }
0x15e4   :  { %v2402_v40 = vadd.f32 %v2930_v43, %v2644_v42  ;;  %v2396_v44 = vpop.f32.mrb[19].mxu0 }
0x15e5   :  { %v2397_v45 = vadd.f32 %v2644_v42, %v2396_v44 }
0x15e6   :  { %v2406_v2 = vadd.f32 %v2402_v40, %v2194_v4 }
0x15e7   :  { %v2405_v1 = vadd.f32 %v2397_v45, %v2193_v0  ;;  %v3026_v0 = vpack.c.bf16 %v2461_v62, %v2460_v61 }
0x15e8   :  { %v2414_v46 = vsel %vm67_vm0, %v2406_v2, 0.0 }
0x15e9   :  { %2415 = vadd.xlane.f32.xlu0 %v2414_v46  ;;  %v2411_v58 = vsel %vm67_vm0, %v2405_v1, 0.0  ;;  %3027 = vmatpush3.bf16.msra.mxu1 %v3026_v0 }
0x15ea   :  { %2412 = vadd.xlane.f32.xlu1 %v2411_v58 }
0x1676   :  { %v2416_v47 = vpop.xlane.xlu0 %2415 }
0x1677   :  { %v2418_v48 = vmul.f32 0.03125, %v2416_v47  ;;  %v2413_v49 = vpop.xlane.xlu1 %2412 }
0x1678   :  { %v2417_v50 = vmul.f32 0.03125, %v2413_v49 }
0x1679   :  { %v2420_v52 = vsub.f32 %v2406_v2, %v2418_v48 }
0x167a   :  { %v2419_v53 = vsub.f32 %v2405_v1, %v2417_v50 }
0x167b   :  { %v2422_v41 = vmul.f32 %v2420_v52, %v2420_v52 }
0x167c   :  { %v2421_v54 = vmul.f32 %v2419_v53, %v2419_v53 }
0x167d   :  { %v2426_v55 = vsel %vm67_vm0, %v2422_v41, 0.0 }
0x167e   :  { %2427 = vadd.xlane.f32.xlu0 %v2426_v55  ;;  %v2423_v56 = vsel %vm67_vm0, %v2421_v54, 0.0 }
0x167f   :  { %2424 = vadd.xlane.f32.xlu1 %v2423_v56 }
0x170b   :  { %v2428_v3 = vpop.xlane.xlu0 %2427 }
0x170c   :  { %v2430_v4 = vmul.f32 0.03125, %v2428_v3  ;;  %v2425_v5 = vpop.xlane.xlu1 %2424 }
0x170d   :  { %v2429_v6 = vmul.f32 0.03125, %v2425_v5 }
0x170e   :  { %v2432_v7 = vadd.f32 1e-12, %v2430_v4 }
0x170f   :  { %v2431_v8 = vadd.f32 1e-12, %v2429_v6 }
0x1710   :  { %3094 = vrsqrt.f32 %v2432_v7 }
0x1711   :  { %3096 = vrsqrt.f32 %v2431_v8 }
0x171a   :  { %v3095_v9 = vpop.eup %3094 }
0x171b   :  { %v3097_v11 = vpop.eup %3096  ;;  %v2436_v12 = vmul.f32 %v3095_v9, %v2420_v52 }
0x171c   :  { %v2435_v13 = vmul.f32 %v3097_v11, %v2419_v53 }
0x171d   :  { %v2444_v15 = vmul.f32 %v2649_v10, %v2436_v12 }
0x171e   :  { %v2443_v16 = vmul.f32 %v2649_v10, %v2435_v13 }
0x171f   :  { %v2452_v17 = vadd.f32 %v2650_v14, %v2444_v15 }
0x1720   :  { %v2451_v18 = vadd.f32 %v2650_v14, %v2443_v16 }
0x1721   :  { %v2454_v19 = vrot.slane %v2452_v17, 7 }
0x1723   :  { %v2457_v20 = vsel %vm2456_vm5, %v2451_v18, %v2454_v19 }
0x1724   :  { %2940 = vmatmul.mubr.msk.f32.vlgmr.msra.gmra.mrb[28].mxu1 %vm67_vm0, %v2457_v20 }
0x17f7   :  { %v2538_v22 = vpop.f32.mrb[28].mxu1 }
0x17f8   :  { %v2539_v23 = vadd.f32 %v2651_v21, %v2538_v22  ;;  %v2941_v24 = vpop.f32.mrb[29].mxu1 }
0x17fa   :  { %3098 = vtanh.f32 %v2539_v23 }
0x1804   :  { %v3099_v33 = vpop.eup %3098 }
0x1805   :  { %v2547_v26 = vmul.f32 %v3099_v33, %v2653_v35 }
0x1807   :  { %v2548_v27 = vmul.f32 1.1111112, %v2547_v26 }
0x1809   :  { %2550 = vst.msk [vmem:[#allocation2] sm:$0x3] %vm2549_vm7, %v2548_v27 }
0x180a   :  { %3111 = shalt.err (!%p3108_p4)
}
0x180b   :  { %s3112_s23 = scalar_lea.hbm %s3685_s19, 32 }
0x180c   :  { %p3113_p5 = scmp.ne.s32.totalorder %s3685_s19, %s3112_s23  ;;  %p3116_p6 = scmp.lt.u32.totalorder %s3112_s23, %s3685_s19 }
0x180e   :  { %p3118_p7 = pnand %p3116_p6, %p3113_p5 }
0x1810   :  { %3121 = shalt.err (!%p3118_p7)
}
0x1811   :  { %2560 = dma.vmem_to_hbm [thread:$0]  %s2558_s7, 32, %s3685_s19, [#allocation3]  }
0x1812   :  { %3122 = dma.done.wait [#allocation3], 32  }
0x1813   :  { %3123 = vsyncadd [#allocation3], 4294967264 }
0x1814   :  { %2564 = vsyncpa [#allocation3], 1 }

</bundles_post_ra>
